<compile_context>
chip_gen: v7x
topology: tpu7x:2x2x1
jax: 0.10.0
libtpu: 0.0.40
codegen_flags: <defaults>
</compile_context>

<pallas_src>
import functools

import jax
import jax.numpy as jnp
from jax import lax
from jax.experimental import pallas as pl
from jax.experimental.pallas import tpu as pltpu


_LN_EPS = 1e-12
_VMEM_LIMIT_BYTES = 32 * 1024 * 1024


def _cparams(sem):
    return pltpu.CompilerParams(dimension_semantics=sem,
                                vmem_limit_bytes=_VMEM_LIMIT_BYTES)


def _round_up(x, m):
    return (x + m - 1) // m * m


def _pick_tm(M, desired=512):
    """Row tile: multiple of 8, <= desired; prefer exact divisors of M."""
    if M <= desired:
        return _round_up(M, 8)
    for tm in range(desired, 7, -8):
        if M % tm == 0:
            return tm
    return desired  # the wrapper pads the ragged tail with zero rows


def _pad_rows(x, Mp):
    M = x.shape[0]
    if Mp == M:
        return x
    return jnp.pad(x, ((0, Mp - M), (0, 0)))


# -------------------- Pallas kernels --------------------

def _ln_kernel(x_ref, g_ref, b_ref, o_ref, *, eps):
    x = x_ref[...].astype(jnp.float32)
    mu = jnp.mean(x, axis=-1, keepdims=True)
    var = jnp.mean((x - mu) ** 2, axis=-1, keepdims=True)
    y = (x - mu) * lax.rsqrt(var + eps) * g_ref[...] + b_ref[...]
    o_ref[...] = y.astype(o_ref.dtype)


def layernorm(x, g, b, eps=_LN_EPS, tm=512):
    """bf16 <- LayerNorm(x); x:[M,H] (f32 or bf16)."""
    M, H = x.shape
    tm = _pick_tm(M, tm)
    Mp = _round_up(M, tm)
    xp = _pad_rows(x, Mp)
    out = pl.pallas_call(
        functools.partial(_ln_kernel, eps=eps),
        out_shape=jax.ShapeDtypeStruct((Mp, H), jnp.bfloat16),
        grid=(Mp // tm,),
        in_specs=[
            pl.BlockSpec((tm, H), lambda i: (i, 0)),
            pl.BlockSpec((1, H), lambda i: (0, 0)),
            pl.BlockSpec((1, H), lambda i: (0, 0)),
        ],
        out_specs=pl.BlockSpec((tm, H), lambda i: (i, 0)),
        compiler_params=_cparams(("parallel",)),
    )(xp, g, b)
    return out[:M] if Mp != M else out


def _linear_kernel(x_ref, w_ref, b_ref, o_ref):
    x = x_ref[...].astype(jnp.bfloat16)
    y = jnp.dot(x, w_ref[...], preferred_element_type=jnp.float32) + b_ref[...]
    o_ref[...] = y.astype(o_ref.dtype)


def linear(x, w, b, tm=512):
    """bf16 <- x @ w + b; x:[M,K], w:[K,N] bf16, b:[1,N] f32."""
    M, K = x.shape
    N = w.shape[1]
    tm = _pick_tm(M, tm)
    Mp = _round_up(M, tm)
    xp = _pad_rows(x, Mp)
    out = pl.pallas_call(
        _linear_kernel,
        out_shape=jax.ShapeDtypeStruct((Mp, N), jnp.bfloat16),
        grid=(Mp // tm,),
        in_specs=[
            pl.BlockSpec((tm, K), lambda i: (i, 0)),
            pl.BlockSpec((K, N), lambda i: (0, 0)),
            pl.BlockSpec((1, N), lambda i: (0, 0)),
        ],
        out_specs=pl.BlockSpec((tm, N), lambda i: (i, 0)),
        compiler_params=_cparams(("parallel",)),
    )(xp, w, b)
    return out[:M] if Mp != M else out


def _attn_block_kernel(x_ref, m_ref, qkvw_ref, qkvb_ref, ow_ref, ob_ref,
                       g_ref, b_ref, o_ref, *, nH, dH, scale, eps):
    """Fused QKV projection + MHA + output projection + residual + LayerNorm."""
    Hd = nH * dH
    x = x_ref[...]                                  # (S, Hd) bf16
    bias = m_ref[...]                               # (1, S)  f32
    qkv = jnp.dot(x, qkvw_ref[...], preferred_element_type=jnp.float32)
    qkv = (qkv + qkvb_ref[...]).astype(jnp.bfloat16)        # (S, 3*Hd)
    ow = ow_ref[...]                                # (Hd, Hd) bf16

    acc = jnp.zeros((x.shape[0], Hd), jnp.float32)
    for h in range(nH):
        # pre-scale q in bf16 (cheaper than scaling the (S,S) score matrix)
        q = qkv[:, h * dH:(h + 1) * dH] * scale
        k = qkv[:, Hd + h * dH:Hd + (h + 1) * dH]
        v = qkv[:, 2 * Hd + h * dH:2 * Hd + (h + 1) * dH]
        s = lax.dot_general(q, k, (((1,), (1,)), ((), ())),
                            preferred_element_type=jnp.float32)
        s = s + bias
        s = s - jnp.max(s, axis=-1, keepdims=True)
        e = jnp.exp(s)
        p = (e * pl.reciprocal(jnp.sum(e, axis=-1, keepdims=True),
                               approx=True)).astype(jnp.bfloat16)
        ctx = jnp.dot(p, v, preferred_element_type=jnp.float32)    # (S, dH)
        # accumulate the output projection head-by-head: no concatenate,
        # no sub-128-lane stores, ctx tiles are not all live at once.
        acc = acc + jnp.dot(ctx.astype(jnp.bfloat16), ow[h * dH:(h + 1) * dH, :],
                            preferred_element_type=jnp.float32)

    y = acc + ob_ref[...] + x.astype(jnp.float32)                  # residual
    mu = jnp.mean(y, axis=-1, keepdims=True)
    var = jnp.mean((y - mu) ** 2, axis=-1, keepdims=True)
    y = (y - mu) * lax.rsqrt(var + eps) * g_ref[...] + b_ref[...]
    o_ref[...] = y.astype(o_ref.dtype)


def attention_block(xb, mask_bias, qkv_w, qkv_b, o_w, o_b, ln_g, ln_b, *,
                    nH, eps=_LN_EPS):
    """xb:[B,S,Hd] bf16 -> LN1(xb + MHA(xb) @ o_w + o_b) as bf16."""
    B, S, Hd = xb.shape
    dH = Hd // nH
    scale = 1.0 / (dH ** 0.5)
    return pl.pallas_call(
        functools.partial(_attn_block_kernel, nH=nH, dH=dH, scale=scale, eps=eps),
        out_shape=jax.ShapeDtypeStruct((B, S, Hd), jnp.bfloat16),
        grid=(B,),
        in_specs=[
            pl.BlockSpec((None, S, Hd), lambda b: (b, 0, 0)),
            pl.BlockSpec((None, 1, S), lambda b: (b, 0, 0)),
            pl.BlockSpec((Hd, 3 * Hd), lambda b: (0, 0)),
            pl.BlockSpec((1, 3 * Hd), lambda b: (0, 0)),
            pl.BlockSpec((Hd, Hd), lambda b: (0, 0)),
            pl.BlockSpec((1, Hd), lambda b: (0, 0)),
            pl.BlockSpec((1, Hd), lambda b: (0, 0)),
            pl.BlockSpec((1, Hd), lambda b: (0, 0)),
        ],
        out_specs=pl.BlockSpec((None, S, Hd), lambda b: (b, 0, 0)),
        compiler_params=_cparams(("parallel",)),
    )(xb, mask_bias, qkv_w, qkv_b, o_w, o_b, ln_g, ln_b)


def _ffn_block_kernel(x_ref, iw_ref, ib_ref, fw_ref, fb_ref, g_ref, b_ref,
                      o_ref, *, eps):
    """Fused FFN: gelu(x@i_w+i_b) @ f_w + f_b + x, then LayerNorm."""
    x = x_ref[...].astype(jnp.bfloat16)                         # (tm, Hd)
    h = jnp.dot(x, iw_ref[...], preferred_element_type=jnp.float32) + ib_ref[...]
    # TODO(synk): exact erf-GELU (HF BERT) vs tanh approximation used here.
    h = jax.nn.gelu(h, approximate=True)
    y = jnp.dot(h.astype(jnp.bfloat16), fw_ref[...],
                preferred_element_type=jnp.float32)
    y = y + fb_ref[...] + x.astype(jnp.float32)                 # residual
    mu = jnp.mean(y, axis=-1, keepdims=True)
    var = jnp.mean((y - mu) ** 2, axis=-1, keepdims=True)
    y = (y - mu) * lax.rsqrt(var + eps) * g_ref[...] + b_ref[...]
    o_ref[...] = y.astype(o_ref.dtype)


def ffn_block(x, i_w, i_b, f_w, f_b, g, b, eps=_LN_EPS, tm=512):
    M, Hd = x.shape
    F = i_w.shape[1]
    tm = _pick_tm(M, tm)
    Mp = _round_up(M, tm)
    xp = _pad_rows(x, Mp)
    out = pl.pallas_call(
        functools.partial(_ffn_block_kernel, eps=eps),
        out_shape=jax.ShapeDtypeStruct((Mp, Hd), jnp.bfloat16),
        grid=(Mp // tm,),
        in_specs=[
            pl.BlockSpec((tm, Hd), lambda i: (i, 0)),
            pl.BlockSpec((Hd, F), lambda i: (0, 0)),
            pl.BlockSpec((1, F), lambda i: (0, 0)),
            pl.BlockSpec((F, Hd), lambda i: (0, 0)),
            pl.BlockSpec((1, Hd), lambda i: (0, 0)),
            pl.BlockSpec((1, Hd), lambda i: (0, 0)),
            pl.BlockSpec((1, Hd), lambda i: (0, 0)),
        ],
        out_specs=pl.BlockSpec((tm, Hd), lambda i: (i, 0)),
        compiler_params=_cparams(("parallel",)),
    )(xp, i_w, i_b, f_w, f_b, g, b)
    return out[:M] if Mp != M else out


def _sic_interp_kernel(s_ref, e_ref, w_ref, b_ref, m_ref, H_ref, a_ref, *, Hd):
    """Fused SIC span combine + InterpretationModel (per batch element).

    s_ref rows hold [W1 h_i | W3 h_i | W4 h_i]; e_ref rows hold
    [W3 h_j | W4 h_j | W2 h_j] (weights were reordered at prepare time).
    """
    s = s_ref[...].astype(jnp.float32)      # (Ns, 3*Hd)
    e = e_ref[...].astype(jnp.float32)      # (Ns, 3*Hd)
    w1i = s[:, 0:Hd]
    w3i = s[:, Hd:2 * Hd]
    w4i = s[:, 2 * Hd:3 * Hd]
    w3j = e[:, 0:Hd]
    w4j = e[:, Hd:2 * Hd]
    w2j = e[:, 2 * Hd:3 * Hd]
    h = jnp.tanh(w1i + w2j + (w3i - w3j) + w4i * w4j)        # (Ns, Hd) f32

    # lane-dense scores (1, Ns): (1,Hd) . (Ns,Hd) contracting Hd
    o = lax.dot_general(w_ref[...], h, (((1,), (1,)), ((), ())),
                        preferred_element_type=jnp.float32)
    o = o + b_ref[...] - m_ref[...]
    o = o - jnp.max(o, axis=-1, keepdims=True)
    ex = jnp.exp(o)
    a = ex / jnp.sum(ex, axis=-1, keepdims=True)             # exact (user-visible)
    H_ref[...] = jnp.dot(a, h, preferred_element_type=jnp.float32)   # (1, Hd)
    a_ref[...] = a                                                   # (1, Ns)


def sic_interpretation(g_start, g_end, ht_w_row, ht_b, span_masks):
    """g_start/g_end:[B,Ns,3*Hd] bf16, ht_w_row:[1,Hd], span_masks:[B,Ns]."""
    B, Ns, H3 = g_start.shape
    Hd = H3 // 3
    m = span_masks.reshape(B, 1, Ns).astype(jnp.float32)
    H_out, a_out = pl.pallas_call(
        functools.partial(_sic_interp_kernel, Hd=Hd),
        out_shape=(jax.ShapeDtypeStruct((B, 1, Hd), jnp.float32),
                   jax.ShapeDtypeStruct((B, 1, Ns), jnp.float32)),
        grid=(B,),
        in_specs=[
            pl.BlockSpec((None, Ns, H3), lambda b: (b, 0, 0)),
            pl.BlockSpec((None, Ns, H3), lambda b: (b, 0, 0)),
            pl.BlockSpec((1, Hd), lambda b: (0, 0)),
            pl.BlockSpec((1, 1), lambda b: (0, 0)),
            pl.BlockSpec((None, 1, Ns), lambda b: (b, 0, 0)),
        ],
        out_specs=(pl.BlockSpec((None, 1, Hd), lambda b: (b, 0, 0)),
                   pl.BlockSpec((None, 1, Ns), lambda b: (b, 0, 0))),
        compiler_params=_cparams(("parallel",)),
    )(g_start, g_end, ht_w_row, ht_b, m)
    return H_out.reshape(B, Hd), a_out.reshape(B, Ns)


def _head_kernel(h_ref, cls_ref, w1_ref, b1_ref, w2_ref, b2_ref, o_ref):
    x = h_ref[...] + jnp.tanh(cls_ref[...].astype(jnp.float32))
    y = jnp.dot(x.astype(jnp.bfloat16), w1_ref[...],
                preferred_element_type=jnp.float32) + b1_ref[...]
    y = jnp.maximum(y, 0.0)
    o_ref[...] = jnp.dot(y.astype(jnp.bfloat16), w2_ref[...],
                         preferred_element_type=jnp.float32) + b2_ref[...]


def classification_head(H, cls_vec, w1, b1, w2, b2):
    """out = relu((H + tanh(cls)) @ w1 + b1) @ w2 + b2  — one fused kernel."""
    B, Hd = H.shape
    NL = w2.shape[1]
    return pl.pallas_call(
        _head_kernel,
        out_shape=jax.ShapeDtypeStruct((B, NL), jnp.float32),
        grid=(1,),
        in_specs=[
            pl.BlockSpec((B, Hd), lambda i: (0, 0)),
            pl.BlockSpec((B, Hd), lambda i: (0, 0)),
            pl.BlockSpec((Hd, Hd), lambda i: (0, 0)),
            pl.BlockSpec((1, Hd), lambda i: (0, 0)),
            pl.BlockSpec((Hd, NL), lambda i: (0, 0)),
            pl.BlockSpec((1, NL), lambda i: (0, 0)),
        ],
        out_specs=pl.BlockSpec((B, NL), lambda i: (0, 0)),
        compiler_params=_cparams(("arbitrary",)),
    )(H, cls_vec, w1, b1, w2, b2)


# -------------------- parameter init (deterministic, synthetic) --------------------

def init_params(key, *, vocab, max_pos, Hd, ffn, n_layers, num_labels):
    ks = list(jax.random.split(key, 16 * n_layers + 32))
    it = iter(ks)

    def dense(i, o):
        return jax.random.normal(next(it), (i, o), jnp.float32) * 0.02

    def bias(o):
        return jnp.zeros((1, o), jnp.float32)

    p = {
        "word_emb": jax.random.normal(next(it), (vocab, Hd), jnp.float32) * 0.02,
        "pos_emb": jax.random.normal(next(it), (max_pos, Hd), jnp.float32) * 0.02,
        "type_emb": jax.random.normal(next(it), (2, Hd), jnp.float32) * 0.02,
        "emb_ln_g": jnp.ones((1, Hd), jnp.float32),
        "emb_ln_b": jnp.zeros((1, Hd), jnp.float32),
    }
    layers = []
    for _ in range(n_layers):
        layers.append(dict(
            q_w=dense(Hd, Hd), q_b=bias(Hd),
            k_w=dense(Hd, Hd), k_b=bias(Hd),
            v_w=dense(Hd, Hd), v_b=bias(Hd),
            o_w=dense(Hd, Hd), o_b=bias(Hd),
            ln1_g=jnp.ones((1, Hd), jnp.float32), ln1_b=jnp.zeros((1, Hd), jnp.float32),
            i_w=dense(Hd, ffn), i_b=bias(ffn),
            f_w=dense(ffn, Hd), f_b=bias(Hd),
            ln2_g=jnp.ones((1, Hd), jnp.float32), ln2_b=jnp.zeros((1, Hd), jnp.float32),
        ))
    p["layers"] = layers
    for n in ("w1", "w2", "w3", "w4"):        # SICModel W_1..W_4
        p[f"sic_{n}_w"] = dense(Hd, Hd)
        p[f"sic_{n}_b"] = bias(Hd)
    p["ht_w"] = dense(Hd, 1)                  # InterpretationModel h_t
    p["ht_b"] = jnp.zeros((1, 1), jnp.float32)
    p["out1_w"] = dense(Hd, Hd)               # output head
    p["out1_b"] = bias(Hd)
    p["out2_w"] = dense(Hd, num_labels)
    p["out2_b"] = bias(num_labels)
    return p


def prepare_params(p):
    """Fuse QKV / SIC weights, reorder SIC cols, cast matmul weights to bf16."""
    bf = lambda a: a.astype(jnp.bfloat16)
    cp = {
        "word_emb": p["word_emb"], "pos_emb": p["pos_emb"], "type_emb": p["type_emb"],
        "emb_ln_g": p["emb_ln_g"], "emb_ln_b": p["emb_ln_b"],
        # column order [W1, W3, W4, W2]: start rows need cols [0:3H),
        # end rows need cols [H:4H) — both contiguous slices.
        "sic_w": bf(jnp.concatenate([p["sic_w1_w"], p["sic_w3_w"],
                                     p["sic_w4_w"], p["sic_w2_w"]], axis=1)),
        "sic_b": jnp.concatenate([p["sic_w1_b"], p["sic_w3_b"],
                                  p["sic_w4_b"], p["sic_w2_b"]], axis=1),
        "ht_w": p["ht_w"].T,                       # (1, Hd) lane-dense
        "ht_b": p["ht_b"],
        "out1_w": bf(p["out1_w"]), "out1_b": p["out1_b"],
        "out2_w": bf(p["out2_w"]), "out2_b": p["out2_b"],
    }
    layers = []
    for lp in p["layers"]:
        layers.append(dict(
            qkv_w=bf(jnp.concatenate([lp["q_w"], lp["k_w"], lp["v_w"]], axis=1)),
            qkv_b=jnp.concatenate([lp["q_b"], lp["k_b"], lp["v_b"]], axis=1),
            o_w=bf(lp["o_w"]), o_b=lp["o_b"],
            ln1_g=lp["ln1_g"], ln1_b=lp["ln1_b"],
            i_w=bf(lp["i_w"]), i_b=lp["i_b"],
            f_w=bf(lp["f_w"]), f_b=lp["f_b"],
            ln2_g=lp["ln2_g"], ln2_b=lp["ln2_b"],
        ))
    cp["layers"] = layers
    return cp


# -------------------- forward pass (glue + Pallas kernels) --------------------

def explainable_model_forward(params, input_ids, start_indexs, end_indexs,
                              span_masks, *, nH):
    B, S = input_ids.shape
    Hd = params["word_emb"].shape[1]
    M = B * S

    # attention_mask = (input_ids != 1).long()   (pad-token id == 1)
    attn_mask = (input_ids != 1).astype(jnp.float32)                  # [B, S]
    mask_bias = ((1.0 - attn_mask) * -10000.0).reshape(B, 1, S)

    # ---- embeddings (gathers are glue; LayerNorm runs in a Pallas kernel) ----
    tok = jnp.take(params["word_emb"], input_ids, axis=0)             # [B, S, Hd]
    pos = params["pos_emb"][:S][None, :, :]
    typ = params["type_emb"][0][None, None, :]
    emb = (tok + pos + typ).reshape(M, Hd).astype(jnp.float32)
    x = layernorm(emb, params["emb_ln_g"], params["emb_ln_b"])        # bf16 [M, Hd]

    # ---- transformer encoder: two fused pallas_calls per layer ----
    for lp in params["layers"]:
        xb = attention_block(x.reshape(B, S, Hd), mask_bias,
                             lp["qkv_w"], lp["qkv_b"], lp["o_w"], lp["o_b"],
                             lp["ln1_g"], lp["ln1_b"], nH=nH)
        x = ffn_block(xb.reshape(M, Hd), lp["i_w"], lp["i_b"],
                      lp["f_w"], lp["f_b"], lp["ln2_g"], lp["ln2_b"])

    hidden_states = x.reshape(B, S, Hd)                               # bf16
    cls_vec = hidden_states[:, 0, :]                                  # [B, Hd]

    # ---- SICModel: fused [W1|W3|W4|W2] projection (bf16 stream), span gathers ----
    W_all = linear(x, params["sic_w"], params["sic_b"]).reshape(B, S, 4 * Hd)
    g_start = jnp.take(W_all[:, :, :3 * Hd], start_indexs, axis=1)    # [B,Ns,3Hd]
    g_end = jnp.take(W_all[:, :, Hd:], end_indexs, axis=1)            # [B,Ns,3Hd]

    # ---- SIC combine + InterpretationModel (fused, h_ij stays in VMEM) ----
    H, a_ij = sic_interpretation(g_start, g_end,
                                 params["ht_w"], params["ht_b"], span_masks)

    # ---- classification head: H + tanh(h_cls) -> Linear -> ReLU -> Linear ----
    out = classification_head(H, cls_vec,
                              params["out1_w"], params["out1_b"],
                              params["out2_w"], params["out2_b"])
    return out, a_ij


# -------------------- demo --------------------

if __name__ == "__main__":
    # Small shapes (original model uses hidden 768/1024; synthetic BERT uses 128).
    B, S, Hd, nH, ffn, n_layers = 2, 8, 128, 4, 256, 2
    vocab, max_pos, num_labels, Ns = 64, 32, 3, 8

    key = jax.random.PRNGKey(0)
    pkey, ikey, skey = jax.random.split(key, 3)
    raw_params = init_params(pkey, vocab=vocab, max_pos=max_pos, Hd=Hd,
                             ffn=ffn, n_layers=n_layers, num_labels=num_labels)
    params = prepare_params(raw_params)

    input_ids = jax.random.randint(ikey, (B, S), 0, vocab, dtype=jnp.int32)
    input_ids = input_ids.at[:, -2:].set(1)          # pad token id == 1

    start_indexs = jnp.array([0, 0, 1, 2, 3, 1, 2, 0], dtype=jnp.int32)
    end_indexs = jnp.array([3, 5, 4, 5, 5, 2, 3, 7], dtype=jnp.int32)
    span_masks = jnp.where(jax.random.uniform(skey, (B, Ns)) < 0.25,
                           1e6, 0.0).astype(jnp.float32)

    fwd = jax.jit(functools.partial(explainable_model_forward, nH=nH))
    out, a_ij = fwd(params, input_ids, start_indexs, end_indexs, span_masks)
    jax.block_until_ready((out, a_ij))
    assert out.shape == (B, num_labels) and a_ij.shape == (B, Ns)
    print("KERNEL_OK")
</pallas_src>

<mosaic_0001>
module attributes {stable_mosaic.version = 11 : i64} {
  func.func @_ln_kernel(%arg0: i32, %arg1: memref<16x128xf32, #tpu.memory_space<vmem>>, %arg2: memref<1x128xf32, #tpu.memory_space<vmem>>, %arg3: memref<1x128xf32, #tpu.memory_space<vmem>>, %arg4: memref<16x128xbf16, #tpu.memory_space<vmem>>) attributes {dimension_semantics = [#tpu.dimension_semantics<parallel>], iteration_bounds = array<i64: 1>, scalar_prefetch = 0 : i64, scratch_operands = 0 : i64, tpu.core_type = #tpu.core_type<tc>, window_params = [{transform_indices = @transform_0, window_bounds = array<i64: 16, 128>}, {pipeline_mode = #tpu.pipeline_mode<synchronous>, transform_indices = @transform_1, window_bounds = array<i64: 1, 128>}, {pipeline_mode = #tpu.pipeline_mode<synchronous>, transform_indices = @transform_2, window_bounds = array<i64: 1, 128>}, {transform_indices = @transform_3, window_bounds = array<i64: 16, 128>}]} {
    %c0 = arith.constant 0 : index
    %c0_0 = arith.constant 0 : index
    %0 = vector.load %arg1[%c0, %c0_0] : memref<16x128xf32, #tpu.memory_space<vmem>>, vector<16x128xf32>
    %cst = arith.constant dense<0.000000e+00> : vector<16xf32>
    %1 = vector.multi_reduction <add>, %0, %cst [1] : vector<16x128xf32> to vector<16xf32>
    %2 = vector.shape_cast %1 : vector<16xf32> to vector<16x1xf32>
    %cst_1 = arith.constant 1.280000e+02 : f32
    %3 = vector.broadcast %cst_1 : f32 to vector<16x1xf32>
    %4 = arith.divf %2, %3 : vector<16x1xf32>
    %5 = vector.broadcast %4 : vector<16x1xf32> to vector<16x128xf32>
    %6 = arith.subf %0, %5 : vector<16x128xf32>
    %7 = arith.mulf %6, %6 : vector<16x128xf32>
    %cst_2 = arith.constant dense<0.000000e+00> : vector<16xf32>
    %8 = vector.multi_reduction <add>, %7, %cst_2 [1] : vector<16x128xf32> to vector<16xf32>
    %9 = vector.shape_cast %8 : vector<16xf32> to vector<16x1xf32>
    %cst_3 = arith.constant 1.280000e+02 : f32
    %10 = vector.broadcast %cst_3 : f32 to vector<16x1xf32>
    %11 = arith.divf %9, %10 : vector<16x1xf32>
    %12 = vector.broadcast %4 : vector<16x1xf32> to vector<16x128xf32>
    %13 = arith.subf %0, %12 : vector<16x128xf32>
    %cst_4 = arith.constant 9.99999996E-13 : f32
    %14 = vector.broadcast %cst_4 : f32 to vector<16x1xf32>
    %15 = arith.addf %11, %14 : vector<16x1xf32>
    %16 = math.rsqrt %15 : vector<16x1xf32>
    %17 = vector.broadcast %16 : vector<16x1xf32> to vector<16x128xf32>
    %18 = arith.mulf %13, %17 : vector<16x128xf32>
    %c0_5 = arith.constant 0 : index
    %c0_6 = arith.constant 0 : index
    %19 = vector.load %arg2[%c0_5, %c0_6] : memref<1x128xf32, #tpu.memory_space<vmem>>, vector<1x128xf32>
    %20 = vector.broadcast %19 : vector<1x128xf32> to vector<16x128xf32>
    %21 = arith.mulf %18, %20 : vector<16x128xf32>
    %c0_7 = arith.constant 0 : index
    %c0_8 = arith.constant 0 : index
    %22 = vector.load %arg3[%c0_7, %c0_8] : memref<1x128xf32, #tpu.memory_space<vmem>>, vector<1x128xf32>
    %23 = vector.broadcast %22 : vector<1x128xf32> to vector<16x128xf32>
    %24 = arith.addf %21, %23 : vector<16x128xf32>
    %25 = arith.truncf %24 : vector<16x128xf32> to vector<16x128xbf16>
    %c0_9 = arith.constant 0 : index
    %c0_10 = arith.constant 0 : index
    %26 = vector.load %arg4[%c0_9, %c0_10] : memref<16x128xbf16, #tpu.memory_space<vmem>>, vector<16x128xbf16>
    tpu.vector_store %arg4[%c0_9, %c0_10], %25 {strides = array<i32>} : memref<16x128xbf16, #tpu.memory_space<vmem>>, vector<16x128xbf16>,
    return
  }
  func.func @transform_0(%arg0: i32) -> (i32, i32) {
    %c0_i32 = arith.constant 0 : i32
    %c0_i32_0 = arith.constant 0 : i32
    return %arg0, %c0_i32 : i32, i32
  }
  func.func @transform_1(%arg0: i32) -> (i32, i32) {
    %c0_i32 = arith.constant 0 : i32
    %c0_i32_0 = arith.constant 0 : i32
    %c0_i32_1 = arith.constant 0 : i32
    return %c0_i32, %c0_i32_0 : i32, i32
  }
  func.func @transform_2(%arg0: i32) -> (i32, i32) {
    %c0_i32 = arith.constant 0 : i32
    %c0_i32_0 = arith.constant 0 : i32
    %c0_i32_1 = arith.constant 0 : i32
    return %c0_i32, %c0_i32_0 : i32, i32
  }
  func.func @transform_3(%arg0: i32) -> (i32, i32) {
    %c0_i32 = arith.constant 0 : i32
    %c0_i32_0 = arith.constant 0 : i32
    return %arg0, %c0_i32 : i32, i32
  }
}

module attributes {stable_mosaic.version = 11 : i64} {
  func.func @_attn_block_kernel(%arg0: i32, %arg1: memref<1x8x128xbf16, #tpu.memory_space<vmem>>, %arg2: memref<1x1x8xf32, #tpu.memory_space<vmem>>, %arg3: memref<128x384xbf16, #tpu.memory_space<vmem>>, %arg4: memref<1x384xf32, #tpu.memory_space<vmem>>, %arg5: memref<128x128xbf16, #tpu.memory_space<vmem>>, %arg6: memref<1x128xf32, #tpu.memory_space<vmem>>, %arg7: memref<1x128xf32, #tpu.memory_space<vmem>>, %arg8: memref<1x128xf32, #tpu.memory_space<vmem>>, %arg9: memref<1x8x128xbf16, #tpu.memory_space<vmem>>) attributes {dimension_semantics = [#tpu.dimension_semantics<parallel>], iteration_bounds = array<i64: 2>, scalar_prefetch = 0 : i64, scratch_operands = 0 : i64, tpu.core_type = #tpu.core_type<tc>, window_params = [{transform_indices = @transform_0, window_bounds = array<i64: 1, 8, 128>}, {transform_indices = @transform_1, window_bounds = array<i64: 1, 1, 8>}, {pipeline_mode = #tpu.pipeline_mode<synchronous>, transform_indices = @transform_2, window_bounds = array<i64: 128, 384>}, {pipeline_mode = #tpu.pipeline_mode<synchronous>, transform_indices = @transform_3, window_bounds = array<i64: 1, 384>}, {pipeline_mode = #tpu.pipeline_mode<synchronous>, transform_indices = @transform_4, window_bounds = array<i64: 128, 128>}, {pipeline_mode = #tpu.pipeline_mode<synchronous>, transform_indices = @transform_5, window_bounds = array<i64: 1, 128>}, {pipeline_mode = #tpu.pipeline_mode<synchronous>, transform_indices = @transform_6, window_bounds = array<i64: 1, 128>}, {pipeline_mode = #tpu.pipeline_mode<synchronous>, transform_indices = @transform_7, window_bounds = array<i64: 1, 128>}, {transform_indices = @transform_8, window_bounds = array<i64: 1, 8, 128>}]} {
    %c0 = arith.constant 0 : index
    %c0_0 = arith.constant 0 : index
    %c0_1 = arith.constant 0 : index
    %0 = vector.load %arg1[%c0, %c0_0, %c0_1] : memref<1x8x128xbf16, #tpu.memory_space<vmem>>, vector<1x8x128xbf16>
    %1 = vector.shape_cast %0 : vector<1x8x128xbf16> to vector<8x128xbf16>
    %c0_2 = arith.constant 0 : index
    %c0_3 = arith.constant 0 : index
    %c0_4 = arith.constant 0 : index
    %2 = vector.load %arg2[%c0_2, %c0_3, %c0_4] : memref<1x1x8xf32, #tpu.memory_space<vmem>>, vector<1x1x8xf32>
    %3 = vector.shape_cast %2 : vector<1x1x8xf32> to vector<1x8xf32>
    %c0_5 = arith.constant 0 : index
    %c0_6 = arith.constant 0 : index
    %4 = vector.load %arg3[%c0_5, %c0_6] : memref<128x384xbf16, #tpu.memory_space<vmem>>, vector<128x384xbf16>
    %cst = arith.constant dense<0.000000e+00> : vector<8x384xf32>
    %5 = tpu.matmul %1, %4, %cst {dimension_numbers = #tpu.dot_dimension_numbers<[1], [0], [0], [1], [0, 0, 1, 1], [], []>} : vector<8x128xbf16>, vector<128x384xbf16>, vector<8x384xf32> -> vector<8x384xf32>
    %c0_7 = arith.constant 0 : index
    %c0_8 = arith.constant 0 : index
    %6 = vector.load %arg4[%c0_7, %c0_8] : memref<1x384xf32, #tpu.memory_space<vmem>>, vector<1x384xf32>
    %7 = vector.broadcast %6 : vector<1x384xf32> to vector<8x384xf32>
    %8 = arith.addf %5, %7 : vector<8x384xf32>
    %9 = arith.truncf %8 : vector<8x384xf32> to vector<8x384xbf16>
    %c0_9 = arith.constant 0 : index
    %c0_10 = arith.constant 0 : index
    %10 = vector.load %arg5[%c0_9, %c0_10] : memref<128x128xbf16, #tpu.memory_space<vmem>>, vector<128x128xbf16>
    %cst_11 = arith.constant 0.000000e+00 : f32
    %11 = vector.broadcast %cst_11 : f32 to vector<8x128xf32>
    %12 = vector.extract_strided_slice %9 {offsets = [0, 0], sizes = [8, 32], strides = [1, 1]} : vector<8x384xbf16> to vector<8x32xbf16>
    %cst_12 = arith.constant 1.767580e-01 : bf16
    %13 = vector.broadcast %cst_12 : bf16 to vector<8x32xbf16>
    %14 = arith.mulf %12, %13 : vector<8x32xbf16>
    %15 = vector.extract_strided_slice %9 {offsets = [0, 128], sizes = [8, 32], strides = [1, 1]} : vector<8x384xbf16> to vector<8x32xbf16>
    %16 = vector.extract_strided_slice %9 {offsets = [0, 256], sizes = [8, 32], strides = [1, 1]} : vector<8x384xbf16> to vector<8x32xbf16>
    %cst_13 = arith.constant dense<0.000000e+00> : vector<8x8xf32>
    %17 = tpu.matmul %14, %15, %cst_13 {dimension_numbers = #tpu.dot_dimension_numbers<[1], [1], [0], [0], [0, 0, 1, 0], [], []>} : vector<8x32xbf16>, vector<8x32xbf16>, vector<8x8xf32> -> vector<8x8xf32>
    %18 = vector.broadcast %3 : vector<1x8xf32> to vector<8x8xf32>
    %19 = arith.addf %17, %18 : vector<8x8xf32>
    %cst_14 = arith.constant dense<0xFF800000> : vector<8xf32>
    %20 = vector.multi_reduction <maximumf>, %19, %cst_14 [1] : vector<8x8xf32> to vector<8xf32>
    %21 = vector.shape_cast %20 : vector<8xf32> to vector<8x1xf32>
    %22 = vector.broadcast %21 : vector<8x1xf32> to vector<8x8xf32>
    %23 = arith.subf %19, %22 : vector<8x8xf32>
    %24 = math.exp %23 : vector<8x8xf32>
    %cst_15 = arith.constant dense<0.000000e+00> : vector<8xf32>
    %25 = vector.multi_reduction <add>, %24, %cst_15 [1] : vector<8x8xf32> to vector<8xf32>
    %26 = vector.shape_cast %25 : vector<8xf32> to vector<8x1xf32>
    %27 = tpu.reciprocal %26 {approx = true} : vector<8x1xf32> -> vector<8x1xf32>
    %28 = vector.broadcast %27 : vector<8x1xf32> to vector<8x8xf32>
    %29 = arith.mulf %24, %28 : vector<8x8xf32>
    %30 = arith.truncf %29 : vector<8x8xf32> to vector<8x8xbf16>
    %cst_16 = arith.constant dense<0.000000e+00> : vector<8x32xf32>
    %31 = tpu.matmul %30, %16, %cst_16 {dimension_numbers = #tpu.dot_dimension_numbers<[1], [0], [0], [1], [0, 0, 1, 1], [], []>} : vector<8x8xbf16>, vector<8x32xbf16>, vector<8x32xf32> -> vector<8x32xf32>
    %32 = arith.truncf %31 : vector<8x32xf32> to vector<8x32xbf16>
    %33 = vector.extract_strided_slice %10 {offsets = [0, 0], sizes = [32, 128], strides = [1, 1]} : vector<128x128xbf16> to vector<32x128xbf16>
    %cst_17 = arith.constant dense<0.000000e+00> : vector<8x128xf32>
    %34 = tpu.matmul %32, %33, %cst_17 {dimension_numbers = #tpu.dot_dimension_numbers<[1], [0], [0], [1], [0, 0, 1, 1], [], []>} : vector<8x32xbf16>, vector<32x128xbf16>, vector<8x128xf32> -> vector<8x128xf32>
    %35 = arith.addf %11, %34 : vector<8x128xf32>
    %36 = vector.extract_strided_slice %9 {offsets = [0, 32], sizes = [8, 32], strides = [1, 1]} : vector<8x384xbf16> to vector<8x32xbf16>
    %cst_18 = arith.constant 1.767580e-01 : bf16
    %37 = vector.broadcast %cst_18 : bf16 to vector<8x32xbf16>
    %38 = arith.mulf %36, %37 : vector<8x32xbf16>
    %39 = vector.extract_strided_slice %9 {offsets = [0, 160], sizes = [8, 32], strides = [1, 1]} : vector<8x384xbf16> to vector<8x32xbf16>
    %40 = vector.extract_strided_slice %9 {offsets = [0, 288], sizes = [8, 32], strides = [1, 1]} : vector<8x384xbf16> to vector<8x32xbf16>
    %cst_19 = arith.constant dense<0.000000e+00> : vector<8x8xf32>
    %41 = tpu.matmul %38, %39, %cst_19 {dimension_numbers = #tpu.dot_dimension_numbers<[1], [1], [0], [0], [0, 0, 1, 0], [], []>} : vector<8x32xbf16>, vector<8x32xbf16>, vector<8x8xf32> -> vector<8x8xf32>
    %42 = vector.broadcast %3 : vector<1x8xf32> to vector<8x8xf32>
    %43 = arith.addf %41, %42 : vector<8x8xf32>
    %cst_20 = arith.constant dense<0xFF800000> : vector<8xf32>
    %44 = vector.multi_reduction <maximumf>, %43, %cst_20 [1] : vector<8x8xf32> to vector<8xf32>
    %45 = vector.shape_cast %44 : vector<8xf32> to vector<8x1xf32>
    %46 = vector.broadcast %45 : vector<8x1xf32> to vector<8x8xf32>
    %47 = arith.subf %43, %46 : vector<8x8xf32>
    %48 = math.exp %47 : vector<8x8xf32>
    %cst_21 = arith.constant dense<0.000000e+00> : vector<8xf32>
    %49 = vector.multi_reduction <add>, %48, %cst_21 [1] : vector<8x8xf32> to vector<8xf32>
    %50 = vector.shape_cast %49 : vector<8xf32> to vector<8x1xf32>
    %51 = tpu.reciprocal %50 {approx = true} : vector<8x1xf32> -> vector<8x1xf32>
    %52 = vector.broadcast %51 : vector<8x1xf32> to vector<8x8xf32>
    %53 = arith.mulf %48, %52 : vector<8x8xf32>
    %54 = arith.truncf %53 : vector<8x8xf32> to vector<8x8xbf16>
    %cst_22 = arith.constant dense<0.000000e+00> : vector<8x32xf32>
    %55 = tpu.matmul %54, %40, %cst_22 {dimension_numbers = #tpu.dot_dimension_numbers<[1], [0], [0], [1], [0, 0, 1, 1], [], []>} : vector<8x8xbf16>, vector<8x32xbf16>, vector<8x32xf32> -> vector<8x32xf32>
    %56 = arith.truncf %55 : vector<8x32xf32> to vector<8x32xbf16>
    %57 = vector.extract_strided_slice %10 {offsets = [32, 0], sizes = [32, 128], strides = [1, 1]} : vector<128x128xbf16> to vector<32x128xbf16>
    %cst_23 = arith.constant dense<0.000000e+00> : vector<8x128xf32>
    %58 = tpu.matmul %56, %57, %cst_23 {dimension_numbers = #tpu.dot_dimension_numbers<[1], [0], [0], [1], [0, 0, 1, 1], [], []>} : vector<8x32xbf16>, vector<32x128xbf16>, vector<8x128xf32> -> vector<8x128xf32>
    %59 = arith.addf %35, %58 : vector<8x128xf32>
    %60 = vector.extract_strided_slice %9 {offsets = [0, 64], sizes = [8, 32], strides = [1, 1]} : vector<8x384xbf16> to vector<8x32xbf16>
    %cst_24 = arith.constant 1.767580e-01 : bf16
    %61 = vector.broadcast %cst_24 : bf16 to vector<8x32xbf16>
    %62 = arith.mulf %60, %61 : vector<8x32xbf16>
    %63 = vector.extract_strided_slice %9 {offsets = [0, 192], sizes = [8, 32], strides = [1, 1]} : vector<8x384xbf16> to vector<8x32xbf16>
    %64 = vector.extract_strided_slice %9 {offsets = [0, 320], sizes = [8, 32], strides = [1, 1]} : vector<8x384xbf16> to vector<8x32xbf16>
    %cst_25 = arith.constant dense<0.000000e+00> : vector<8x8xf32>
    %65 = tpu.matmul %62, %63, %cst_25 {dimension_numbers = #tpu.dot_dimension_numbers<[1], [1], [0], [0], [0, 0, 1, 0], [], []>} : vector<8x32xbf16>, vector<8x32xbf16>, vector<8x8xf32> -> vector<8x8xf32>
    %66 = vector.broadcast %3 : vector<1x8xf32> to vector<8x8xf32>
    %67 = arith.addf %65, %66 : vector<8x8xf32>
    %cst_26 = arith.constant dense<0xFF800000> : vector<8xf32>
    %68 = vector.multi_reduction <maximumf>, %67, %cst_26 [1] : vector<8x8xf32> to vector<8xf32>
    %69 = vector.shape_cast %68 : vector<8xf32> to vector<8x1xf32>
    %70 = vector.broadcast %69 : vector<8x1xf32> to vector<8x8xf32>
    %71 = arith.subf %67, %70 : vector<8x8xf32>
    %72 = math.exp %71 : vector<8x8xf32>
    %cst_27 = arith.constant dense<0.000000e+00> : vector<8xf32>
    %73 = vector.multi_reduction <add>, %72, %cst_27 [1] : vector<8x8xf32> to vector<8xf32>
    %74 = vector.shape_cast %73 : vector<8xf32> to vector<8x1xf32>
    %75 = tpu.reciprocal %74 {approx = true} : vector<8x1xf32> -> vector<8x1xf32>
    %76 = vector.broadcast %75 : vector<8x1xf32> to vector<8x8xf32>
    %77 = arith.mulf %72, %76 : vector<8x8xf32>
    %78 = arith.truncf %77 : vector<8x8xf32> to vector<8x8xbf16>
    %cst_28 = arith.constant dense<0.000000e+00> : vector<8x32xf32>
    %79 = tpu.matmul %78, %64, %cst_28 {dimension_numbers = #tpu.dot_dimension_numbers<[1], [0], [0], [1], [0, 0, 1, 1], [], []>} : vector<8x8xbf16>, vector<8x32xbf16>, vector<8x32xf32> -> vector<8x32xf32>
    %80 = arith.truncf %79 : vector<8x32xf32> to vector<8x32xbf16>
    %81 = vector.extract_strided_slice %10 {offsets = [64, 0], sizes = [32, 128], strides = [1, 1]} : vector<128x128xbf16> to vector<32x128xbf16>
    %cst_29 = arith.constant dense<0.000000e+00> : vector<8x128xf32>
    %82 = tpu.matmul %80, %81, %cst_29 {dimension_numbers = #tpu.dot_dimension_numbers<[1], [0], [0], [1], [0, 0, 1, 1], [], []>} : vector<8x32xbf16>, vector<32x128xbf16>, vector<8x128xf32> -> vector<8x128xf32>
    %83 = arith.addf %59, %82 : vector<8x128xf32>
    %84 = vector.extract_strided_slice %9 {offsets = [0, 96], sizes = [8, 32], strides = [1, 1]} : vector<8x384xbf16> to vector<8x32xbf16>
    %cst_30 = arith.constant 1.767580e-01 : bf16
    %85 = vector.broadcast %cst_30 : bf16 to vector<8x32xbf16>
    %86 = arith.mulf %84, %85 : vector<8x32xbf16>
    %87 = vector.extract_strided_slice %9 {offsets = [0, 224], sizes = [8, 32], strides = [1, 1]} : vector<8x384xbf16> to vector<8x32xbf16>
    %88 = vector.extract_strided_slice %9 {offsets = [0, 352], sizes = [8, 32], strides = [1, 1]} : vector<8x384xbf16> to vector<8x32xbf16>
    %cst_31 = arith.constant dense<0.000000e+00> : vector<8x8xf32>
    %89 = tpu.matmul %86, %87, %cst_31 {dimension_numbers = #tpu.dot_dimension_numbers<[1], [1], [0], [0], [0, 0, 1, 0], [], []>} : vector<8x32xbf16>, vector<8x32xbf16>, vector<8x8xf32> -> vector<8x8xf32>
    %90 = vector.broadcast %3 : vector<1x8xf32> to vector<8x8xf32>
    %91 = arith.addf %89, %90 : vector<8x8xf32>
    %cst_32 = arith.constant dense<0xFF800000> : vector<8xf32>
    %92 = vector.multi_reduction <maximumf>, %91, %cst_32 [1] : vector<8x8xf32> to vector<8xf32>
    %93 = vector.shape_cast %92 : vector<8xf32> to vector<8x1xf32>
    %94 = vector.broadcast %93 : vector<8x1xf32> to vector<8x8xf32>
    %95 = arith.subf %91, %94 : vector<8x8xf32>
    %96 = math.exp %95 : vector<8x8xf32>
    %cst_33 = arith.constant dense<0.000000e+00> : vector<8xf32>
    %97 = vector.multi_reduction <add>, %96, %cst_33 [1] : vector<8x8xf32> to vector<8xf32>
    %98 = vector.shape_cast %97 : vector<8xf32> to vector<8x1xf32>
    %99 = tpu.reciprocal %98 {approx = true} : vector<8x1xf32> -> vector<8x1xf32>
    %100 = vector.broadcast %99 : vector<8x1xf32> to vector<8x8xf32>
    %101 = arith.mulf %96, %100 : vector<8x8xf32>
    %102 = arith.truncf %101 : vector<8x8xf32> to vector<8x8xbf16>
    %cst_34 = arith.constant dense<0.000000e+00> : vector<8x32xf32>
    %103 = tpu.matmul %102, %88, %cst_34 {dimension_numbers = #tpu.dot_dimension_numbers<[1], [0], [0], [1], [0, 0, 1, 1], [], []>} : vector<8x8xbf16>, vector<8x32xbf16>, vector<8x32xf32> -> vector<8x32xf32>
    %104 = arith.truncf %103 : vector<8x32xf32> to vector<8x32xbf16>
    %105 = vector.extract_strided_slice %10 {offsets = [96, 0], sizes = [32, 128], strides = [1, 1]} : vector<128x128xbf16> to vector<32x128xbf16>
    %cst_35 = arith.constant dense<0.000000e+00> : vector<8x128xf32>
    %106 = tpu.matmul %104, %105, %cst_35 {dimension_numbers = #tpu.dot_dimension_numbers<[1], [0], [0], [1], [0, 0, 1, 1], [], []>} : vector<8x32xbf16>, vector<32x128xbf16>, vector<8x128xf32> -> vector<8x128xf32>
    %107 = arith.addf %83, %106 : vector<8x128xf32>
    %c0_36 = arith.constant 0 : index
    %c0_37 = arith.constant 0 : index
    %108 = vector.load %arg6[%c0_36, %c0_37] : memref<1x128xf32, #tpu.memory_space<vmem>>, vector<1x128xf32>
    %109 = vector.broadcast %108 : vector<1x128xf32> to vector<8x128xf32>
    %110 = arith.addf %107, %109 : vector<8x128xf32>
    %111 = arith.extf %1 : vector<8x128xbf16> to vector<8x128xf32>
    %112 = arith.addf %110, %111 : vector<8x128xf32>
    %cst_38 = arith.constant dense<0.000000e+00> : vector<8xf32>
    %113 = vector.multi_reduction <add>, %112, %cst_38 [1] : vector<8x128xf32> to vector<8xf32>
    %114 = vector.shape_cast %113 : vector<8xf32> to vector<8x1xf32>
    %cst_39 = arith.constant 1.280000e+02 : f32
    %115 = vector.broadcast %cst_39 : f32 to vector<8x1xf32>
    %116 = arith.divf %114, %115 : vector<8x1xf32>
    %117 = vector.broadcast %116 : vector<8x1xf32> to vector<8x128xf32>
    %118 = arith.subf %112, %117 : vector<8x128xf32>
    %119 = arith.mulf %118, %118 : vector<8x128xf32>
    %cst_40 = arith.constant dense<0.000000e+00> : vector<8xf32>
    %120 = vector.multi_reduction <add>, %119, %cst_40 [1] : vector<8x128xf32> to vector<8xf32>
    %121 = vector.shape_cast %120 : vector<8xf32> to vector<8x1xf32>
    %cst_41 = arith.constant 1.280000e+02 : f32
    %122 = vector.broadcast %cst_41 : f32 to vector<8x1xf32>
    %123 = arith.divf %121, %122 : vector<8x1xf32>
    %124 = vector.broadcast %116 : vector<8x1xf32> to vector<8x128xf32>
    %125 = arith.subf %112, %124 : vector<8x128xf32>
    %cst_42 = arith.constant 9.99999996E-13 : f32
    %126 = vector.broadcast %cst_42 : f32 to vector<8x1xf32>
    %127 = arith.addf %123, %126 : vector<8x1xf32>
    %128 = math.rsqrt %127 : vector<8x1xf32>
    %129 = vector.broadcast %128 : vector<8x1xf32> to vector<8x128xf32>
    %130 = arith.mulf %125, %129 : vector<8x128xf32>
    %c0_43 = arith.constant 0 : index
    %c0_44 = arith.constant 0 : index
    %131 = vector.load %arg7[%c0_43, %c0_44] : memref<1x128xf32, #tpu.memory_space<vmem>>, vector<1x128xf32>
    %132 = vector.broadcast %131 : vector<1x128xf32> to vector<8x128xf32>
    %133 = arith.mulf %130, %132 : vector<8x128xf32>
    %c0_45 = arith.constant 0 : index
    %c0_46 = arith.constant 0 : index
    %134 = vector.load %arg8[%c0_45, %c0_46] : memref<1x128xf32, #tpu.memory_space<vmem>>, vector<1x128xf32>
    %135 = vector.broadcast %134 : vector<1x128xf32> to vector<8x128xf32>
    %136 = arith.addf %133, %135 : vector<8x128xf32>
    %137 = arith.truncf %136 : vector<8x128xf32> to vector<8x128xbf16>
    %c0_47 = arith.constant 0 : index
    %c0_48 = arith.constant 0 : index
    %c0_49 = arith.constant 0 : index
    %138 = vector.load %arg9[%c0_47, %c0_48, %c0_49] : memref<1x8x128xbf16, #tpu.memory_space<vmem>>, vector<1x8x128xbf16>
    %139 = vector.shape_cast %138 : vector<1x8x128xbf16> to vector<8x128xbf16>
    %140 = vector.shape_cast %137 : vector<8x128xbf16> to vector<1x8x128xbf16>
    tpu.vector_store %arg9[%c0_47, %c0_48, %c0_49], %140 {strides = array<i32>} : memref<1x8x128xbf16, #tpu.memory_space<vmem>>, vector<1x8x128xbf16>,
    return
  }
  func.func @transform_0(%arg0: i32) -> (i32, i32, i32) {
    %c0_i32 = arith.constant 0 : i32
    %c0_i32_0 = arith.constant 0 : i32
    %c0_i32_1 = arith.constant 0 : i32
    return %arg0, %c0_i32, %c0_i32_0 : i32, i32, i32
  }
  func.func @transform_1(%arg0: i32) -> (i32, i32, i32) {
    %c0_i32 = arith.constant 0 : i32
    %c0_i32_0 = arith.constant 0 : i32
    %c0_i32_1 = arith.constant 0 : i32
    return %arg0, %c0_i32, %c0_i32_0 : i32, i32, i32
  }
  func.func @transform_2(%arg0: i32) -> (i32, i32) {
    %c0_i32 = arith.constant 0 : i32
    %c0_i32_0 = arith.constant 0 : i32
    %c0_i32_1 = arith.constant 0 : i32
    return %c0_i32, %c0_i32_0 : i32, i32
  }
  func.func @transform_3(%arg0: i32) -> (i32, i32) {
    %c0_i32 = arith.constant 0 : i32
    %c0_i32_0 = arith.constant 0 : i32
    %c0_i32_1 = arith.constant 0 : i32
    return %c0_i32, %c0_i32_0 : i32, i32
  }
  func.func @transform_4(%arg0: i32) -> (i32, i32) {
    %c0_i32 = arith.constant 0 : i32
    %c0_i32_0 = arith.constant 0 : i32
    %c0_i32_1 = arith.constant 0 : i32
    return %c0_i32, %c0_i32_0 : i32, i32
  }
  func.func @transform_5(%arg0: i32) -> (i32, i32) {
    %c0_i32 = arith.constant 0 : i32
    %c0_i32_0 = arith.constant 0 : i32
    %c0_i32_1 = arith.constant 0 : i32
    return %c0_i32, %c0_i32_0 : i32, i32
  }
  func.func @transform_6(%arg0: i32) -> (i32, i32) {
    %c0_i32 = arith.constant 0 : i32
    %c0_i32_0 = arith.constant 0 : i32
    %c0_i32_1 = arith.constant 0 : i32
    return %c0_i32, %c0_i32_0 : i32, i32
  }
  func.func @transform_7(%arg0: i32) -> (i32, i32) {
    %c0_i32 = arith.constant 0 : i32
    %c0_i32_0 = arith.constant 0 : i32
    %c0_i32_1 = arith.constant 0 : i32
    return %c0_i32, %c0_i32_0 : i32, i32
  }
  func.func @transform_8(%arg0: i32) -> (i32, i32, i32) {
    %c0_i32 = arith.constant 0 : i32
    %c0_i32_0 = arith.constant 0 : i32
    %c0_i32_1 = arith.constant 0 : i32
    return %arg0, %c0_i32, %c0_i32_0 : i32, i32, i32
  }
}

module attributes {stable_mosaic.version = 11 : i64} {
  func.func @_ffn_block_kernel(%arg0: i32, %arg1: memref<16x128xbf16, #tpu.memory_space<vmem>>, %arg2: memref<128x256xbf16, #tpu.memory_space<vmem>>, %arg3: memref<1x256xf32, #tpu.memory_space<vmem>>, %arg4: memref<256x128xbf16, #tpu.memory_space<vmem>>, %arg5: memref<1x128xf32, #tpu.memory_space<vmem>>, %arg6: memref<1x128xf32, #tpu.memory_space<vmem>>, %arg7: memref<1x128xf32, #tpu.memory_space<vmem>>, %arg8: memref<16x128xbf16, #tpu.memory_space<vmem>>) attributes {dimension_semantics = [#tpu.dimension_semantics<parallel>], iteration_bounds = array<i64: 1>, scalar_prefetch = 0 : i64, scratch_operands = 0 : i64, tpu.core_type = #tpu.core_type<tc>, window_params = [{transform_indices = @transform_0, window_bounds = array<i64: 16, 128>}, {pipeline_mode = #tpu.pipeline_mode<synchronous>, transform_indices = @transform_1, window_bounds = array<i64: 128, 256>}, {pipeline_mode = #tpu.pipeline_mode<synchronous>, transform_indices = @transform_2, window_bounds = array<i64: 1, 256>}, {pipeline_mode = #tpu.pipeline_mode<synchronous>, transform_indices = @transform_3, window_bounds = array<i64: 256, 128>}, {pipeline_mode = #tpu.pipeline_mode<synchronous>, transform_indices = @transform_4, window_bounds = array<i64: 1, 128>}, {pipeline_mode = #tpu.pipeline_mode<synchronous>, transform_indices = @transform_5, window_bounds = array<i64: 1, 128>}, {pipeline_mode = #tpu.pipeline_mode<synchronous>, transform_indices = @transform_6, window_bounds = array<i64: 1, 128>}, {transform_indices = @transform_7, window_bounds = array<i64: 16, 128>}]} {
    %c0 = arith.constant 0 : index
    %c0_0 = arith.constant 0 : index
    %0 = vector.load %arg1[%c0, %c0_0] : memref<16x128xbf16, #tpu.memory_space<vmem>>, vector<16x128xbf16>
    %c0_1 = arith.constant 0 : index
    %c0_2 = arith.constant 0 : index
    %1 = vector.load %arg2[%c0_1, %c0_2] : memref<128x256xbf16, #tpu.memory_space<vmem>>, vector<128x256xbf16>
    %cst = arith.constant dense<0.000000e+00> : vector<16x256xf32>
    %2 = tpu.matmul %0, %1, %cst {dimension_numbers = #tpu.dot_dimension_numbers<[1], [0], [0], [1], [0, 0, 1, 1], [], []>} : vector<16x128xbf16>, vector<128x256xbf16>, vector<16x256xf32> -> vector<16x256xf32>
    %c0_3 = arith.constant 0 : index
    %c0_4 = arith.constant 0 : index
    %3 = vector.load %arg3[%c0_3, %c0_4] : memref<1x256xf32, #tpu.memory_space<vmem>>, vector<1x256xf32>
    %4 = vector.broadcast %3 : vector<1x256xf32> to vector<16x256xf32>
    %5 = arith.addf %2, %4 : vector<16x256xf32>
    %6 = arith.mulf %5, %5 : vector<16x256xf32>
    %7 = arith.mulf %5, %6 : vector<16x256xf32>
    %cst_5 = arith.constant 4.471500e-02 : f32
    %8 = vector.broadcast %cst_5 : f32 to vector<16x256xf32>
    %9 = arith.mulf %8, %7 : vector<16x256xf32>
    %10 = arith.addf %5, %9 : vector<16x256xf32>
    %cst_6 = arith.constant 0.797884583 : f32
    %11 = vector.broadcast %cst_6 : f32 to vector<16x256xf32>
    %12 = arith.mulf %11, %10 : vector<16x256xf32>
    %13 = math.tanh %12 : vector<16x256xf32>
    %cst_7 = arith.constant 1.000000e+00 : f32
    %14 = vector.broadcast %cst_7 : f32 to vector<16x256xf32>
    %15 = arith.addf %14, %13 : vector<16x256xf32>
    %cst_8 = arith.constant 5.000000e-01 : f32
    %16 = vector.broadcast %cst_8 : f32 to vector<16x256xf32>
    %17 = arith.mulf %16, %15 : vector<16x256xf32>
    %18 = arith.mulf %5, %17 : vector<16x256xf32>
    %19 = arith.truncf %18 : vector<16x256xf32> to vector<16x256xbf16>
    %c0_9 = arith.constant 0 : index
    %c0_10 = arith.constant 0 : index
    %20 = vector.load %arg4[%c0_9, %c0_10] : memref<256x128xbf16, #tpu.memory_space<vmem>>, vector<256x128xbf16>
    %cst_11 = arith.constant dense<0.000000e+00> : vector<16x128xf32>
    %21 = tpu.matmul %19, %20, %cst_11 {dimension_numbers = #tpu.dot_dimension_numbers<[1], [0], [0], [1], [0, 0, 1, 1], [], []>} : vector<16x256xbf16>, vector<256x128xbf16>, vector<16x128xf32> -> vector<16x128xf32>
    %c0_12 = arith.constant 0 : index
    %c0_13 = arith.constant 0 : index
    %22 = vector.load %arg5[%c0_12, %c0_13] : memref<1x128xf32, #tpu.memory_space<vmem>>, vector<1x128xf32>
    %23 = vector.broadcast %22 : vector<1x128xf32> to vector<16x128xf32>
    %24 = arith.addf %21, %23 : vector<16x128xf32>
    %25 = arith.extf %0 : vector<16x128xbf16> to vector<16x128xf32>
    %26 = arith.addf %24, %25 : vector<16x128xf32>
    %cst_14 = arith.constant dense<0.000000e+00> : vector<16xf32>
    %27 = vector.multi_reduction <add>, %26, %cst_14 [1] : vector<16x128xf32> to vector<16xf32>
    %28 = vector.shape_cast %27 : vector<16xf32> to vector<16x1xf32>
    %cst_15 = arith.constant 1.280000e+02 : f32
    %29 = vector.broadcast %cst_15 : f32 to vector<16x1xf32>
    %30 = arith.divf %28, %29 : vector<16x1xf32>
    %31 = vector.broadcast %30 : vector<16x1xf32> to vector<16x128xf32>
    %32 = arith.subf %26, %31 : vector<16x128xf32>
    %33 = arith.mulf %32, %32 : vector<16x128xf32>
    %cst_16 = arith.constant dense<0.000000e+00> : vector<16xf32>
    %34 = vector.multi_reduction <add>, %33, %cst_16 [1] : vector<16x128xf32> to vector<16xf32>
    %35 = vector.shape_cast %34 : vector<16xf32> to vector<16x1xf32>
    %cst_17 = arith.constant 1.280000e+02 : f32
    %36 = vector.broadcast %cst_17 : f32 to vector<16x1xf32>
    %37 = arith.divf %35, %36 : vector<16x1xf32>
    %38 = vector.broadcast %30 : vector<16x1xf32> to vector<16x128xf32>
    %39 = arith.subf %26, %38 : vector<16x128xf32>
    %cst_18 = arith.constant 9.99999996E-13 : f32
    %40 = vector.broadcast %cst_18 : f32 to vector<16x1xf32>
    %41 = arith.addf %37, %40 : vector<16x1xf32>
    %42 = math.rsqrt %41 : vector<16x1xf32>
    %43 = vector.broadcast %42 : vector<16x1xf32> to vector<16x128xf32>
    %44 = arith.mulf %39, %43 : vector<16x128xf32>
    %c0_19 = arith.constant 0 : index
    %c0_20 = arith.constant 0 : index
    %45 = vector.load %arg6[%c0_19, %c0_20] : memref<1x128xf32, #tpu.memory_space<vmem>>, vector<1x128xf32>
    %46 = vector.broadcast %45 : vector<1x128xf32> to vector<16x128xf32>
    %47 = arith.mulf %44, %46 : vector<16x128xf32>
    %c0_21 = arith.constant 0 : index
    %c0_22 = arith.constant 0 : index
    %48 = vector.load %arg7[%c0_21, %c0_22] : memref<1x128xf32, #tpu.memory_space<vmem>>, vector<1x128xf32>
    %49 = vector.broadcast %48 : vector<1x128xf32> to vector<16x128xf32>
    %50 = arith.addf %47, %49 : vector<16x128xf32>
    %51 = arith.truncf %50 : vector<16x128xf32> to vector<16x128xbf16>
    %c0_23 = arith.constant 0 : index
    %c0_24 = arith.constant 0 : index
    %52 = vector.load %arg8[%c0_23, %c0_24] : memref<16x128xbf16, #tpu.memory_space<vmem>>, vector<16x128xbf16>
    tpu.vector_store %arg8[%c0_23, %c0_24], %51 {strides = array<i32>} : memref<16x128xbf16, #tpu.memory_space<vmem>>, vector<16x128xbf16>,
    return
  }
  func.func @transform_0(%arg0: i32) -> (i32, i32) {
    %c0_i32 = arith.constant 0 : i32
    %c0_i32_0 = arith.constant 0 : i32
    return %arg0, %c0_i32 : i32, i32
  }
  func.func @transform_1(%arg0: i32) -> (i32, i32) {
    %c0_i32 = arith.constant 0 : i32
    %c0_i32_0 = arith.constant 0 : i32
    %c0_i32_1 = arith.constant 0 : i32
    return %c0_i32, %c0_i32_0 : i32, i32
  }
  func.func @transform_2(%arg0: i32) -> (i32, i32) {
    %c0_i32 = arith.constant 0 : i32
    %c0_i32_0 = arith.constant 0 : i32
    %c0_i32_1 = arith.constant 0 : i32
    return %c0_i32, %c0_i32_0 : i32, i32
  }
  func.func @transform_3(%arg0: i32) -> (i32, i32) {
    %c0_i32 = arith.constant 0 : i32
    %c0_i32_0 = arith.constant 0 : i32
    %c0_i32_1 = arith.constant 0 : i32
    return %c0_i32, %c0_i32_0 : i32, i32
  }
  func.func @transform_4(%arg0: i32) -> (i32, i32) {
    %c0_i32 = arith.constant 0 : i32
    %c0_i32_0 = arith.constant 0 : i32
    %c0_i32_1 = arith.constant 0 : i32
    return %c0_i32, %c0_i32_0 : i32, i32
  }
  func.func @transform_5(%arg0: i32) -> (i32, i32) {
    %c0_i32 = arith.constant 0 : i32
    %c0_i32_0 = arith.constant 0 : i32
    %c0_i32_1 = arith.constant 0 : i32
    return %c0_i32, %c0_i32_0 : i32, i32
  }
  func.func @transform_6(%arg0: i32) -> (i32, i32) {
    %c0_i32 = arith.constant 0 : i32
    %c0_i32_0 = arith.constant 0 : i32
    %c0_i32_1 = arith.constant 0 : i32
    return %c0_i32, %c0_i32_0 : i32, i32
  }
  func.func @transform_7(%arg0: i32) -> (i32, i32) {
    %c0_i32 = arith.constant 0 : i32
    %c0_i32_0 = arith.constant 0 : i32
    return %arg0, %c0_i32 : i32, i32
  }
}

module attributes {stable_mosaic.version = 11 : i64} {
  func.func @_linear_kernel(%arg0: i32, %arg1: memref<16x128xbf16, #tpu.memory_space<vmem>>, %arg2: memref<128x512xbf16, #tpu.memory_space<vmem>>, %arg3: memref<1x512xf32, #tpu.memory_space<vmem>>, %arg4: memref<16x512xbf16, #tpu.memory_space<vmem>>) attributes {dimension_semantics = [#tpu.dimension_semantics<parallel>], iteration_bounds = array<i64: 1>, scalar_prefetch = 0 : i64, scratch_operands = 0 : i64, tpu.core_type = #tpu.core_type<tc>, window_params = [{transform_indices = @transform_0, window_bounds = array<i64: 16, 128>}, {pipeline_mode = #tpu.pipeline_mode<synchronous>, transform_indices = @transform_1, window_bounds = array<i64: 128, 512>}, {pipeline_mode = #tpu.pipeline_mode<synchronous>, transform_indices = @transform_2, window_bounds = array<i64: 1, 512>}, {transform_indices = @transform_3, window_bounds = array<i64: 16, 512>}]} {
    %c0 = arith.constant 0 : index
    %c0_0 = arith.constant 0 : index
    %0 = vector.load %arg1[%c0, %c0_0] : memref<16x128xbf16, #tpu.memory_space<vmem>>, vector<16x128xbf16>
    %c0_1 = arith.constant 0 : index
    %c0_2 = arith.constant 0 : index
    %1 = vector.load %arg2[%c0_1, %c0_2] : memref<128x512xbf16, #tpu.memory_space<vmem>>, vector<128x512xbf16>
    %cst = arith.constant dense<0.000000e+00> : vector<16x512xf32>
    %2 = tpu.matmul %0, %1, %cst {dimension_numbers = #tpu.dot_dimension_numbers<[1], [0], [0], [1], [0, 0, 1, 1], [], []>} : vector<16x128xbf16>, vector<128x512xbf16>, vector<16x512xf32> -> vector<16x512xf32>
    %c0_3 = arith.constant 0 : index
    %c0_4 = arith.constant 0 : index
    %3 = vector.load %arg3[%c0_3, %c0_4] : memref<1x512xf32, #tpu.memory_space<vmem>>, vector<1x512xf32>
    %4 = vector.broadcast %3 : vector<1x512xf32> to vector<16x512xf32>
    %5 = arith.addf %2, %4 : vector<16x512xf32>
    %6 = arith.truncf %5 : vector<16x512xf32> to vector<16x512xbf16>
    %c0_5 = arith.constant 0 : index
    %c0_6 = arith.constant 0 : index
    %7 = vector.load %arg4[%c0_5, %c0_6] : memref<16x512xbf16, #tpu.memory_space<vmem>>, vector<16x512xbf16>
    tpu.vector_store %arg4[%c0_5, %c0_6], %6 {strides = array<i32>} : memref<16x512xbf16, #tpu.memory_space<vmem>>, vector<16x512xbf16>,
    return
  }
  func.func @transform_0(%arg0: i32) -> (i32, i32) {
    %c0_i32 = arith.constant 0 : i32
    %c0_i32_0 = arith.constant 0 : i32
    return %arg0, %c0_i32 : i32, i32
  }
  func.func @transform_1(%arg0: i32) -> (i32, i32) {
    %c0_i32 = arith.constant 0 : i32
    %c0_i32_0 = arith.constant 0 : i32
    %c0_i32_1 = arith.constant 0 : i32
    return %c0_i32, %c0_i32_0 : i32, i32
  }
  func.func @transform_2(%arg0: i32) -> (i32, i32) {
    %c0_i32 = arith.constant 0 : i32
    %c0_i32_0 = arith.constant 0 : i32
    %c0_i32_1 = arith.constant 0 : i32
    return %c0_i32, %c0_i32_0 : i32, i32
  }
  func.func @transform_3(%arg0: i32) -> (i32, i32) {
    %c0_i32 = arith.constant 0 : i32
    %c0_i32_0 = arith.constant 0 : i32
    return %arg0, %c0_i32 : i32, i32
  }
}

module attributes {stable_mosaic.version = 11 : i64} {
  func.func @_sic_interp_kernel(%arg0: i32, %arg1: memref<1x8x384xbf16, #tpu.memory_space<vmem>>, %arg2: memref<1x8x384xbf16, #tpu.memory_space<vmem>>, %arg3: memref<1x128xf32, #tpu.memory_space<vmem>>, %arg4: memref<1x1xf32, #tpu.memory_space<vmem>>, %arg5: memref<1x1x8xf32, #tpu.memory_space<vmem>>, %arg6: memref<1x1x128xf32, #tpu.memory_space<vmem>>, %arg7: memref<1x1x8xf32, #tpu.memory_space<vmem>>) attributes {dimension_semantics = [#tpu.dimension_semantics<parallel>], iteration_bounds = array<i64: 2>, scalar_prefetch = 0 : i64, scratch_operands = 0 : i64, tpu.core_type = #tpu.core_type<tc>, window_params = [{transform_indices = @transform_0, window_bounds = array<i64: 1, 8, 384>}, {transform_indices = @transform_1, window_bounds = array<i64: 1, 8, 384>}, {pipeline_mode = #tpu.pipeline_mode<synchronous>, transform_indices = @transform_2, window_bounds = array<i64: 1, 128>}, {pipeline_mode = #tpu.pipeline_mode<synchronous>, transform_indices = @transform_3, window_bounds = array<i64: 1, 1>}, {transform_indices = @transform_4, window_bounds = array<i64: 1, 1, 8>}, {transform_indices = @transform_5, window_bounds = array<i64: 1, 1, 128>}, {transform_indices = @transform_6, window_bounds = array<i64: 1, 1, 8>}]} {
    %c0 = arith.constant 0 : index
    %c0_0 = arith.constant 0 : index
    %c0_1 = arith.constant 0 : index
    %0 = vector.load %arg1[%c0, %c0_0, %c0_1] : memref<1x8x384xbf16, #tpu.memory_space<vmem>>, vector<1x8x384xbf16>
    %1 = vector.shape_cast %0 : vector<1x8x384xbf16> to vector<8x384xbf16>
    %2 = arith.extf %1 : vector<8x384xbf16> to vector<8x384xf32>
    %c0_2 = arith.constant 0 : index
    %c0_3 = arith.constant 0 : index
    %c0_4 = arith.constant 0 : index
    %3 = vector.load %arg2[%c0_2, %c0_3, %c0_4] : memref<1x8x384xbf16, #tpu.memory_space<vmem>>, vector<1x8x384xbf16>
    %4 = vector.shape_cast %3 : vector<1x8x384xbf16> to vector<8x384xbf16>
    %5 = arith.extf %4 : vector<8x384xbf16> to vector<8x384xf32>
    %6 = vector.extract_strided_slice %2 {offsets = [0, 0], sizes = [8, 128], strides = [1, 1]} : vector<8x384xf32> to vector<8x128xf32>
    %7 = vector.extract_strided_slice %2 {offsets = [0, 128], sizes = [8, 128], strides = [1, 1]} : vector<8x384xf32> to vector<8x128xf32>
    %8 = vector.extract_strided_slice %2 {offsets = [0, 256], sizes = [8, 128], strides = [1, 1]} : vector<8x384xf32> to vector<8x128xf32>
    %9 = vector.extract_strided_slice %5 {offsets = [0, 0], sizes = [8, 128], strides = [1, 1]} : vector<8x384xf32> to vector<8x128xf32>
    %10 = vector.extract_strided_slice %5 {offsets = [0, 128], sizes = [8, 128], strides = [1, 1]} : vector<8x384xf32> to vector<8x128xf32>
    %11 = vector.extract_strided_slice %5 {offsets = [0, 256], sizes = [8, 128], strides = [1, 1]} : vector<8x384xf32> to vector<8x128xf32>
    %12 = arith.addf %6, %11 : vector<8x128xf32>
    %13 = arith.subf %7, %9 : vector<8x128xf32>
    %14 = arith.addf %12, %13 : vector<8x128xf32>
    %15 = arith.mulf %8, %10 : vector<8x128xf32>
    %16 = arith.addf %14, %15 : vector<8x128xf32>
    %17 = math.tanh %16 : vector<8x128xf32>
    %c0_5 = arith.constant 0 : index
    %c0_6 = arith.constant 0 : index
    %18 = vector.load %arg3[%c0_5, %c0_6] : memref<1x128xf32, #tpu.memory_space<vmem>>, vector<1x128xf32>
    %cst = arith.constant dense<0.000000e+00> : vector<1x8xf32>
    %19 = tpu.matmul %18, %17, %cst {dimension_numbers = #tpu.dot_dimension_numbers<[1], [1], [0], [0], [0, 0, 1, 0], [], []>} : vector<1x128xf32>, vector<8x128xf32>, vector<1x8xf32> -> vector<1x8xf32>
    %c0_7 = arith.constant 0 : index
    %c0_8 = arith.constant 0 : index
    %20 = vector.load %arg4[%c0_7, %c0_8] : memref<1x1xf32, #tpu.memory_space<vmem>>, vector<1x1xf32>
    %21 = vector.broadcast %20 : vector<1x1xf32> to vector<1x8xf32>
    %22 = arith.addf %19, %21 : vector<1x8xf32>
    %c0_9 = arith.constant 0 : index
    %c0_10 = arith.constant 0 : index
    %c0_11 = arith.constant 0 : index
    %23 = vector.load %arg5[%c0_9, %c0_10, %c0_11] : memref<1x1x8xf32, #tpu.memory_space<vmem>>, vector<1x1x8xf32>
    %24 = vector.shape_cast %23 : vector<1x1x8xf32> to vector<1x8xf32>
    %25 = arith.subf %22, %24 : vector<1x8xf32>
    %cst_12 = arith.constant dense<0xFF800000> : vector<1xf32>
    %26 = vector.multi_reduction <maximumf>, %25, %cst_12 [1] : vector<1x8xf32> to vector<1xf32>
    %27 = vector.shape_cast %26 : vector<1xf32> to vector<1x1xf32>
    %28 = vector.broadcast %27 : vector<1x1xf32> to vector<1x8xf32>
    %29 = arith.subf %25, %28 : vector<1x8xf32>
    %30 = math.exp %29 : vector<1x8xf32>
    %cst_13 = arith.constant dense<0.000000e+00> : vector<1xf32>
    %31 = vector.multi_reduction <add>, %30, %cst_13 [1] : vector<1x8xf32> to vector<1xf32>
    %32 = vector.shape_cast %31 : vector<1xf32> to vector<1x1xf32>
    %33 = vector.broadcast %32 : vector<1x1xf32> to vector<1x8xf32>
    %34 = arith.divf %30, %33 : vector<1x8xf32>
    %cst_14 = arith.constant dense<0.000000e+00> : vector<1x128xf32>
    %35 = tpu.matmul %34, %17, %cst_14 {dimension_numbers = #tpu.dot_dimension_numbers<[1], [0], [0], [1], [0, 0, 1, 1], [], []>} : vector<1x8xf32>, vector<8x128xf32>, vector<1x128xf32> -> vector<1x128xf32>
    %c0_15 = arith.constant 0 : index
    %c0_16 = arith.constant 0 : index
    %c0_17 = arith.constant 0 : index
    %36 = vector.load %arg6[%c0_15, %c0_16, %c0_17] : memref<1x1x128xf32, #tpu.memory_space<vmem>>, vector<1x1x128xf32>
    %37 = vector.shape_cast %36 : vector<1x1x128xf32> to vector<1x128xf32>
    %38 = vector.shape_cast %35 : vector<1x128xf32> to vector<1x1x128xf32>
    tpu.vector_store %arg6[%c0_15, %c0_16, %c0_17], %38 {strides = array<i32>} : memref<1x1x128xf32, #tpu.memory_space<vmem>>, vector<1x1x128xf32>,
    %c0_18 = arith.constant 0 : index
    %c0_19 = arith.constant 0 : index
    %c0_20 = arith.constant 0 : index
    %39 = vector.load %arg7[%c0_18, %c0_19, %c0_20] : memref<1x1x8xf32, #tpu.memory_space<vmem>>, vector<1x1x8xf32>
    %40 = vector.shape_cast %39 : vector<1x1x8xf32> to vector<1x8xf32>
    %41 = vector.shape_cast %34 : vector<1x8xf32> to vector<1x1x8xf32>
    tpu.vector_store %arg7[%c0_18, %c0_19, %c0_20], %41 {strides = array<i32>} : memref<1x1x8xf32, #tpu.memory_space<vmem>>, vector<1x1x8xf32>,
    return
  }
  func.func @transform_0(%arg0: i32) -> (i32, i32, i32) {
    %c0_i32 = arith.constant 0 : i32
    %c0_i32_0 = arith.constant 0 : i32
    %c0_i32_1 = arith.constant 0 : i32
    return %arg0, %c0_i32, %c0_i32_0 : i32, i32, i32
  }
  func.func @transform_1(%arg0: i32) -> (i32, i32, i32) {
    %c0_i32 = arith.constant 0 : i32
    %c0_i32_0 = arith.constant 0 : i32
    %c0_i32_1 = arith.constant 0 : i32
    return %arg0, %c0_i32, %c0_i32_0 : i32, i32, i32
  }
  func.func @transform_2(%arg0: i32) -> (i32, i32) {
    %c0_i32 = arith.constant 0 : i32
    %c0_i32_0 = arith.constant 0 : i32
    %c0_i32_1 = arith.constant 0 : i32
    return %c0_i32, %c0_i32_0 : i32, i32
  }
  func.func @transform_3(%arg0: i32) -> (i32, i32) {
    %c0_i32 = arith.constant 0 : i32
    %c0_i32_0 = arith.constant 0 : i32
    %c0_i32_1 = arith.constant 0 : i32
    return %c0_i32, %c0_i32_0 : i32, i32
  }
  func.func @transform_4(%arg0: i32) -> (i32, i32, i32) {
    %c0_i32 = arith.constant 0 : i32
    %c0_i32_0 = arith.constant 0 : i32
    %c0_i32_1 = arith.constant 0 : i32
    return %arg0, %c0_i32, %c0_i32_0 : i32, i32, i32
  }
  func.func @transform_5(%arg0: i32) -> (i32, i32, i32) {
    %c0_i32 = arith.constant 0 : i32
    %c0_i32_0 = arith.constant 0 : i32
    %c0_i32_1 = arith.constant 0 : i32
    return %arg0, %c0_i32, %c0_i32_0 : i32, i32, i32
  }
  func.func @transform_6(%arg0: i32) -> (i32, i32, i32) {
    %c0_i32 = arith.constant 0 : i32
    %c0_i32_0 = arith.constant 0 : i32
    %c0_i32_1 = arith.constant 0 : i32
    return %arg0, %c0_i32, %c0_i32_0 : i32, i32, i32
  }
}

module attributes {stable_mosaic.version = 11 : i64} {
  func.func @_head_kernel(%arg0: i32, %arg1: memref<2x128xf32, #tpu.memory_space<vmem>>, %arg2: memref<2x128xbf16, #tpu.memory_space<vmem>>, %arg3: memref<128x128xbf16, #tpu.memory_space<vmem>>, %arg4: memref<1x128xf32, #tpu.memory_space<vmem>>, %arg5: memref<128x3xbf16, #tpu.memory_space<vmem>>, %arg6: memref<1x3xf32, #tpu.memory_space<vmem>>, %arg7: memref<2x3xf32, #tpu.memory_space<vmem>>) attributes {dimension_semantics = [#tpu.dimension_semantics<arbitrary>], iteration_bounds = array<i64: 1>, scalar_prefetch = 0 : i64, scratch_operands = 0 : i64, tpu.core_type = #tpu.core_type<tc>, window_params = [{pipeline_mode = #tpu.pipeline_mode<synchronous>, transform_indices = @transform_0, window_bounds = array<i64: 2, 128>}, {pipeline_mode = #tpu.pipeline_mode<synchronous>, transform_indices = @transform_1, window_bounds = array<i64: 2, 128>}, {pipeline_mode = #tpu.pipeline_mode<synchronous>, transform_indices = @transform_2, window_bounds = array<i64: 128, 128>}, {pipeline_mode = #tpu.pipeline_mode<synchronous>, transform_indices = @transform_3, window_bounds = array<i64: 1, 128>}, {pipeline_mode = #tpu.pipeline_mode<synchronous>, transform_indices = @transform_4, window_bounds = array<i64: 128, 3>}, {pipeline_mode = #tpu.pipeline_mode<synchronous>, transform_indices = @transform_5, window_bounds = array<i64: 1, 3>}, {pipeline_mode = #tpu.pipeline_mode<synchronous>, transform_indices = @transform_6, window_bounds = array<i64: 2, 3>}]} {
    %c0 = arith.constant 0 : index
    %c0_0 = arith.constant 0 : index
    %0 = vector.load %arg1[%c0, %c0_0] : memref<2x128xf32, #tpu.memory_space<vmem>>, vector<2x128xf32>
    %c0_1 = arith.constant 0 : index
    %c0_2 = arith.constant 0 : index
    %1 = vector.load %arg2[%c0_1, %c0_2] : memref<2x128xbf16, #tpu.memory_space<vmem>>, vector<2x128xbf16>
    %2 = arith.extf %1 : vector<2x128xbf16> to vector<2x128xf32>
    %3 = math.tanh %2 : vector<2x128xf32>
    %4 = arith.addf %0, %3 : vector<2x128xf32>
    %5 = arith.truncf %4 : vector<2x128xf32> to vector<2x128xbf16>
    %c0_3 = arith.constant 0 : index
    %c0_4 = arith.constant 0 : index
    %6 = vector.load %arg3[%c0_3, %c0_4] : memref<128x128xbf16, #tpu.memory_space<vmem>>, vector<128x128xbf16>
    %cst = arith.constant dense<0.000000e+00> : vector<2x128xf32>
    %7 = tpu.matmul %5, %6, %cst {dimension_numbers = #tpu.dot_dimension_numbers<[1], [0], [0], [1], [0, 0, 1, 1], [], []>} : vector<2x128xbf16>, vector<128x128xbf16>, vector<2x128xf32> -> vector<2x128xf32>
    %c0_5 = arith.constant 0 : index
    %c0_6 = arith.constant 0 : index
    %8 = vector.load %arg4[%c0_5, %c0_6] : memref<1x128xf32, #tpu.memory_space<vmem>>, vector<1x128xf32>
    %9 = vector.broadcast %8 : vector<1x128xf32> to vector<2x128xf32>
    %10 = arith.addf %7, %9 : vector<2x128xf32>
    %cst_7 = arith.constant 0.000000e+00 : f32
    %11 = vector.broadcast %cst_7 : f32 to vector<2x128xf32>
    %12 = arith.maximumf %10, %11 : vector<2x128xf32>
    %13 = arith.truncf %12 : vector<2x128xf32> to vector<2x128xbf16>
    %c0_8 = arith.constant 0 : index
    %c0_9 = arith.constant 0 : index
    %14 = vector.load %arg5[%c0_8, %c0_9] : memref<128x3xbf16, #tpu.memory_space<vmem>>, vector<128x3xbf16>
    %cst_10 = arith.constant dense<0.000000e+00> : vector<2x3xf32>
    %15 = tpu.matmul %13, %14, %cst_10 {dimension_numbers = #tpu.dot_dimension_numbers<[1], [0], [0], [1], [0, 0, 1, 1], [], []>} : vector<2x128xbf16>, vector<128x3xbf16>, vector<2x3xf32> -> vector<2x3xf32>
    %c0_11 = arith.constant 0 : index
    %c0_12 = arith.constant 0 : index
    %16 = vector.load %arg6[%c0_11, %c0_12] : memref<1x3xf32, #tpu.memory_space<vmem>>, vector<1x3xf32>
    %17 = vector.broadcast %16 : vector<1x3xf32> to vector<2x3xf32>
    %18 = arith.addf %15, %17 : vector<2x3xf32>
    %c0_13 = arith.constant 0 : index
    %c0_14 = arith.constant 0 : index
    %19 = vector.load %arg7[%c0_13, %c0_14] : memref<2x3xf32, #tpu.memory_space<vmem>>, vector<2x3xf32>
    tpu.vector_store %arg7[%c0_13, %c0_14], %18 {strides = array<i32>} : memref<2x3xf32, #tpu.memory_space<vmem>>, vector<2x3xf32>,
    return
  }
  func.func @transform_0(%arg0: i32) -> (i32, i32) {
    %c0_i32 = arith.constant 0 : i32
    %c0_i32_0 = arith.constant 0 : i32
    %c0_i32_1 = arith.constant 0 : i32
    return %c0_i32, %c0_i32_0 : i32, i32
  }
  func.func @transform_1(%arg0: i32) -> (i32, i32) {
    %c0_i32 = arith.constant 0 : i32
    %c0_i32_0 = arith.constant 0 : i32
    %c0_i32_1 = arith.constant 0 : i32
    return %c0_i32, %c0_i32_0 : i32, i32
  }
  func.func @transform_2(%arg0: i32) -> (i32, i32) {
    %c0_i32 = arith.constant 0 : i32
    %c0_i32_0 = arith.constant 0 : i32
    %c0_i32_1 = arith.constant 0 : i32
    return %c0_i32, %c0_i32_0 : i32, i32
  }
  func.func @transform_3(%arg0: i32) -> (i32, i32) {
    %c0_i32 = arith.constant 0 : i32
    %c0_i32_0 = arith.constant 0 : i32
    %c0_i32_1 = arith.constant 0 : i32
    return %c0_i32, %c0_i32_0 : i32, i32
  }
  func.func @transform_4(%arg0: i32) -> (i32, i32) {
    %c0_i32 = arith.constant 0 : i32
    %c0_i32_0 = arith.constant 0 : i32
    %c0_i32_1 = arith.constant 0 : i32
    return %c0_i32, %c0_i32_0 : i32, i32
  }
  func.func @transform_5(%arg0: i32) -> (i32, i32) {
    %c0_i32 = arith.constant 0 : i32
    %c0_i32_0 = arith.constant 0 : i32
    %c0_i32_1 = arith.constant 0 : i32
    return %c0_i32, %c0_i32_0 : i32, i32
  }
  func.func @transform_6(%arg0: i32) -> (i32, i32) {
    %c0_i32 = arith.constant 0 : i32
    %c0_i32_0 = arith.constant 0 : i32
    %c0_i32_1 = arith.constant 0 : i32
    return %c0_i32, %c0_i32_0 : i32, i32
  }
}

</mosaic_0001>

<bundles_post_ra>
// kernel: explainable_model_forward.8
= control target key start
LH: loop header
LB: loop body
LE: loop exit
PB: predicated region body
PF: predicated region fallthrough
CT: control target
= control target key end

     0   :  { %s121_s0 = inlined_call_operand.vmem [shape: f32[16,128], index: 0, kind: input, shape index: {}]   ;;  %s122_s1 = inlined_call_operand.vmem [shape: f32[1,128], index: 1, kind: input, shape index: {}]   ;;  %s123_s2 = inlined_call_operand.vmem [shape: f32[1,128], index: 2, kind: input, shape index: {}]   ;;  %s124_s3 = inlined_call_operand.vmem [shape: bf16[16,128], index: 3, kind: output, shape index: {}]  }
   0x1   :  { %v14_v0 = vld [vmem:[%s121_s0] sm:$0xff]  ;;  %v15_v1 = vld [vmem:[%s121_s0 + $0x8] sm:$0xff] }
   0x2   :  { %16 = vadd.xlane.f32.xlu0 %v14_v0  ;;  %v71_v18 = vld [vmem:[%s122_s1] ss:$0 sm:$0xff] }
   0x3   :  { %v72_v22 = vld [vmem:[%s123_s2] ss:$0 sm:$0xff] }
   0x6   :  { %18 = vadd.xlane.f32.xlu0 %v15_v1 }
  0x8f   :  { %v17_v2 = vpop.xlane.xlu0 %16 }
  0x90   :  { %v21_v3 = vmul.f32 0.0078125, %v17_v2 }
  0x92   :  { %v23_v4 = vsub.f32 %v14_v0, %v21_v3 }
  0x93   :  { %v19_v5 = vpop.xlane.xlu0 %18 }
  0x94   :  { %v22_v6 = vmul.f32 0.0078125, %v19_v5  ;;  %v25_v7 = vmul.f32 %v23_v4, %v23_v4 }
  0x96   :  { %v24_v8 = vsub.f32 %v15_v1, %v22_v6  ;;  %27 = vadd.xlane.f32.xlu1 %v25_v7 }
  0x98   :  { %v26_v9 = vmul.f32 %v24_v8, %v24_v8 }
  0x9a   :  { %29 = vadd.xlane.f32.xlu1 %v26_v9 }
 0x123   :  { %v28_v10 = vpop.xlane.xlu1 %27 }
 0x124   :  { %v31_v11 = vmul.f32 0.0078125, %v28_v10 }
 0x126   :  { %v33_v12 = vadd.f32 1e-12, %v31_v11 }
 0x127   :  { %v30_v13 = vpop.xlane.xlu1 %29 }
 0x128   :  { %82 = vrsqrt.f32 %v33_v12  ;;  %v32_v14 = vmul.f32 0.0078125, %v30_v13 }
 0x12a   :  { %v34_v15 = vadd.f32 1e-12, %v32_v14 }
 0x12c   :  { %84 = vrsqrt.f32 %v34_v15 }
 0x132   :  { %v83_v16 = vpop.eup %82 }
 0x133   :  { %v37_v17 = vmul.f32 %v83_v16, %v23_v4 }
 0x135   :  { %v46_v20 = vmul.f32 %v71_v18, %v37_v17 }
 0x136   :  { %v85_v19 = vpop.eup %84 }
 0x137   :  { %v38_v21 = vmul.f32 %v85_v19, %v24_v8  ;;  %v55_v24 = vadd.f32 %v72_v22, %v46_v20 }
 0x139   :  { %v47_v23 = vmul.f32 %v71_v18, %v38_v21 }
 0x13b   :  { %v56_v25 = vadd.f32 %v72_v22, %v47_v23 }
 0x13d   :  { %v80_v26 = vpack.c.bf16 %v56_v25, %v55_v24 }
 0x13f   :  { %81 = vst [vmem:[%s124_s3] sm:$0xff] %v80_v26  }

// kernel: explainable_model_forward.13
= control target key start
LH: loop header
LB: loop body
LE: loop exit
PB: predicated region body
PF: predicated region fallthrough
CT: control target
= control target key end

     0   :  { %v446_v1 = vmov 0   ;;  %v51_v34 = vlaneseq  ;;  %s581_s1 = inlined_call_operand.vmem [shape: bf16[128,512], index: 1, kind: input, shape index: {}]   ;;  %s582_s0 = inlined_call_operand.vmem [shape: bf16[16,128], index: 0, kind: input, shape index: {}]   ;;  %s583_s2 = inlined_call_operand.vmem [shape: f32[1,512], index: 2, kind: input, shape index: {}]   ;;  %s584_s3 = inlined_call_operand.vmem [shape: bf16[16,512], index: 3, kind: output, shape index: {}]  }
   0x1   :  { %v397_v0 = vld [vmem:[%s581_s1 + $0x4] ss:$16 sps:$4 sm:$0xff]   ;;  %269 = vmatprep.mubr.bf16.mxu0 %v446_v1  ;;  %312 = vmatprep.mubr.bf16.mxu1 %v446_v1  ;;  %v399_v2 = vld [vmem:[%s581_s1 + $0xc] ss:$16 sps:$4 sm:$0xff]   ;;  %v401_v3 = vld [vmem:[%s581_s1] ss:$16 sps:$4 sm:$0xff]  }
   0x2   :  { %237 = vmatprep.subr.bf16.mxu0 %v397_v0  ;;  %v402_v4 = vld [vmem:[%s581_s1 + $0x8] ss:$16 sps:$4 sm:$0xff]   ;;  %280 = vmatprep.subr.bf16.mxu1 %v399_v2  ;;  %v403_v5 = vld [vmem:[%s581_s1 + $0x24] ss:$16 sps:$4 sm:$0xff]   ;;  %v405_v6 = vld [vmem:[%s581_s1 + $0x2c] ss:$16 sps:$4 sm:$0xff]  }
   0x3   :  { %238 = vmatpush1.bf16.msra.mxu0 %v401_v3  ;;  %281 = vmatpush1.bf16.msra.mxu1 %v402_v4  ;;  %v407_v7 = vld [vmem:[%s581_s1 + $0x20] ss:$16 sps:$4 sm:$0xff]   ;;  %v408_v8 = vld [vmem:[%s581_s1 + $0x28] ss:$16 sps:$4 sm:$0xff]   ;;  %v409_v9 = vld [vmem:[%s581_s1 + $0x44] ss:$16 sps:$4 sm:$0xff]  }
   0x4   :  { %239 = vmatprep.subr.bf16.mxu0 %v403_v5  ;;  %282 = vmatprep.subr.bf16.mxu1 %v405_v6  ;;  %v411_v10 = vld [vmem:[%s581_s1 + $0x4c] ss:$16 sps:$4 sm:$0xff]   ;;  %v413_v11 = vld [vmem:[%s581_s1 + $0x40] ss:$16 sps:$4 sm:$0xff]   ;;  %v414_v12 = vld [vmem:[%s581_s1 + $0x48] ss:$16 sps:$4 sm:$0xff]  }
   0x5   :  { %v415_v13 = vld [vmem:[%s581_s1 + $0x64] ss:$16 sps:$4 sm:$0xff]   ;;  %v417_v14 = vld [vmem:[%s581_s1 + $0x6c] ss:$16 sps:$4 sm:$0xff]   ;;  %v419_v15 = vld [vmem:[%s581_s1 + $0x60] ss:$16 sps:$4 sm:$0xff]  }
   0x6   :  { %v420_v16 = vld [vmem:[%s581_s1 + $0x68] ss:$16 sps:$4 sm:$0xff]   ;;  %v421_v17 = vld [vmem:[%s581_s1 + $0x84] ss:$16 sps:$4 sm:$0xff]   ;;  %v423_v18 = vld [vmem:[%s581_s1 + $0x8c] ss:$16 sps:$4 sm:$0xff]  }
   0x7   :  { %240 = vmatpush1.bf16.msra.mxu0 %v407_v7  ;;  %283 = vmatpush1.bf16.msra.mxu1 %v408_v8  ;;  %v425_v19 = vld [vmem:[%s581_s1 + $0x80] ss:$16 sps:$4 sm:$0xff]   ;;  %v426_v20 = vld [vmem:[%s581_s1 + $0x88] ss:$16 sps:$4 sm:$0xff]   ;;  %v427_v21 = vld [vmem:[%s581_s1 + $0xa4] ss:$16 sps:$4 sm:$0xff]  }
   0x8   :  { %241 = vmatprep.subr.bf16.mxu0 %v409_v9  ;;  %284 = vmatprep.subr.bf16.mxu1 %v411_v10  ;;  %v429_v22 = vld [vmem:[%s581_s1 + $0xac] ss:$16 sps:$4 sm:$0xff]   ;;  %v431_v23 = vld [vmem:[%s581_s1 + $0xa0] ss:$16 sps:$4 sm:$0xff]   ;;  %v432_v24 = vld [vmem:[%s581_s1 + $0xa8] ss:$16 sps:$4 sm:$0xff]  }
   0x9   :  { %v433_v25 = vld [vmem:[%s581_s1 + $0xc4] ss:$16 sps:$4 sm:$0xff]   ;;  %v435_v26 = vld [vmem:[%s581_s1 + $0xcc] ss:$16 sps:$4 sm:$0xff]   ;;  %v437_v27 = vld [vmem:[%s581_s1 + $0xc0] ss:$16 sps:$4 sm:$0xff]  }
   0xa   :  { %v438_v28 = vld [vmem:[%s581_s1 + $0xc8] ss:$16 sps:$4 sm:$0xff]   ;;  %v439_v29 = vld [vmem:[%s581_s1 + $0xe4] ss:$16 sps:$4 sm:$0xff]   ;;  %v441_v30 = vld [vmem:[%s581_s1 + $0xec] ss:$16 sps:$4 sm:$0xff]  }
   0xb   :  { %242 = vmatpush1.bf16.msra.mxu0 %v413_v11  ;;  %285 = vmatpush1.bf16.msra.mxu1 %v414_v12  ;;  %v443_v31 = vld [vmem:[%s581_s1 + $0xe0] ss:$16 sps:$4 sm:$0xff]   ;;  %v444_v32 = vld [vmem:[%s581_s1 + $0xe8] ss:$16 sps:$4 sm:$0xff]   ;;  %v52_v35 = vshrl.u32 %v51_v34, 7 }
   0xc   :  { %243 = vmatprep.subr.bf16.mxu0 %v415_v13  ;;  %286 = vmatprep.subr.bf16.mxu1 %v417_v14  ;;  %v445_v33 = vld [vmem:[%s582_s0] sm:$0xff]  }
   0xd   :  { %v53_v36 = vsub.s32 0, %v52_v35  ;;  %v61_v37 = vsub.s32 2, %v52_v35  ;;  %v49_v38 = vld [vmem:[%s583_s2] sm:$0xf]  ;;  %v57_v39 = vsub.s32 1, %v52_v35  ;;  %v65_v40 = vsub.s32 3, %v52_v35 }
   0xf   :  { %244 = vmatpush1.bf16.msra.mxu0 %v419_v15  ;;  %287 = vmatpush1.bf16.msra.mxu1 %v420_v16  ;;  %v54_v41 = vrot.slane %v49_v38, %v53_v36  ;;  %v62_v42 = vrot.slane %v49_v38, %v61_v37  ;;  %v58_v43 = vrot.slane %v49_v38, %v57_v39 }
  0x10   :  { %245 = vmatprep.subr.bf16.mxu0 %v421_v17  ;;  %288 = vmatprep.subr.bf16.mxu1 %v423_v18  ;;  %v66_v44 = vrot.slane %v49_v38, %v65_v40 }
  0x13   :  { %246 = vmatpush1.bf16.msra.mxu0 %v425_v19  ;;  %289 = vmatpush1.bf16.msra.mxu1 %v426_v20 }
  0x14   :  { %247 = vmatprep.subr.bf16.mxu0 %v427_v21  ;;  %290 = vmatprep.subr.bf16.mxu1 %v429_v22 }
  0x17   :  { %248 = vmatpush1.bf16.msra.mxu0 %v431_v23  ;;  %291 = vmatpush1.bf16.msra.mxu1 %v432_v24 }
  0x18   :  { %249 = vmatprep.subr.bf16.mxu0 %v433_v25  ;;  %292 = vmatprep.subr.bf16.mxu1 %v435_v26 }
  0x1b   :  { %250 = vmatpush1.bf16.msra.mxu0 %v437_v27  ;;  %293 = vmatpush1.bf16.msra.mxu1 %v438_v28 }
  0x1c   :  { %251 = vmatprep.subr.bf16.mxu0 %v439_v29  ;;  %294 = vmatprep.subr.bf16.mxu1 %v441_v30 }
  0x1f   :  { %252 = vmatpush1.bf16.msra.mxu0 %v443_v31  ;;  %295 = vmatpush1.bf16.msra.mxu1 %v444_v32 }
  0x22   :  { %270 = vmatmul.mubr.bf16.vlgmr.msra.gmra.mrb[0].mxu0 %v445_v33  ;;  %313 = vmatmul.mubr.bf16.vlgmr.msra.gmra.mrb[0].mxu1 %v445_v33 }
  0xf5   :  { %v271_v45 = vpop.f32.mrb[0].mxu0  ;;  %v314_v46 = vpop.f32.mrb[0].mxu1 }
  0xf6   :  { %v272_v47 = vadd.f32 %v271_v45, %v54_v41  ;;  %v315_v48 = vadd.f32 %v314_v46, %v62_v42  ;;  %v273_v49 = vpop.f32.mrb[1].mxu0  ;;  %v316_v50 = vpop.f32.mrb[1].mxu1 }
  0xf7   :  { %v274_v51 = vadd.f32 %v273_v49, %v58_v43  ;;  %v317_v52 = vadd.f32 %v316_v50, %v66_v44  ;;  %v275_v53 = vpop.f32.mrb[2].mxu0  ;;  %v318_v54 = vpop.f32.mrb[2].mxu1 }
  0xf8   :  { %v276_v55 = vadd.f32 %v275_v53, %v54_v41  ;;  %v319_v56 = vadd.f32 %v318_v54, %v62_v42  ;;  %v277_v57 = vpop.f32.mrb[3].mxu0  ;;  %v320_v58 = vpop.f32.mrb[3].mxu1 }
  0xf9   :  { %v392_v59 = vpack.c.bf16 %v274_v51, %v272_v47  ;;  %v393_v60 = vpack.c.bf16 %v317_v52, %v315_v48  ;;  %v278_v61 = vadd.f32 %v277_v57, %v58_v43  ;;  %v321_v62 = vadd.f32 %v320_v58, %v66_v44 }
  0xfb   :  { %347 = vst [vmem:[%s584_s3] sm:$0xff] %v392_v59  ;;  %348 = vst [vmem:[%s584_s3 + $0x8] sm:$0xff] %v393_v60  ;;  %v394_v63 = vpack.c.bf16 %v278_v61, %v276_v55  ;;  %v395_v0 = vpack.c.bf16 %v321_v62, %v319_v56 }
  0xfd   :  { %349 = vst [vmem:[%s584_s3 + $0x10] sm:$0xff] %v394_v63  ;;  %350 = vst [vmem:[%s584_s3 + $0x18] sm:$0xff] %v395_v0 }

// kernel: explainable_model_forward.10
= control target key start
LH: loop header
LB: loop body
LE: loop exit
PB: predicated region body
PF: predicated region fallthrough
CT: control target
= control target key end

     0   :  { %v581_v1 = vmov 0   ;;  %v47_v34 = vlaneseq  ;;  %s741_s1 = inlined_call_operand.vmem [shape: bf16[128,256], index: 1, kind: input, shape index: {}]   ;;  %s742_s0 = inlined_call_operand.vmem [shape: bf16[16,128], index: 0, kind: input, shape index: {}]   ;;  %s743_s3 = inlined_call_operand.vmem [shape: bf16[256,128], index: 3, kind: input, shape index: {}]   ;;  %s744_s2 = inlined_call_operand.vmem [shape: f32[1,256], index: 2, kind: input, shape index: {}]   ;;  %s745_s4 = inlined_call_operand.vmem [shape: f32[1,128], index: 4, kind: input, shape index: {}]   ;;  %s746_s5 = inlined_call_operand.vmem [shape: f32[1,128], index: 5, kind: input, shape index: {}]   ;;  %s747_s6 = inlined_call_operand.vmem [shape: f32[1,128], index: 6, kind: input, shape index: {}]   ;;  %s748_s7 = inlined_call_operand.vmem [shape: bf16[16,128], index: 7, kind: output, shape index: {}]  }
   0x1   :  { %v527_v0 = vld [vmem:[%s741_s1 + $0x4] ss:$8 sps:$4 sm:$0xff]   ;;  %175 = vmatprep.mubr.bf16.mxu0 %v581_v1  ;;  %v529_v2 = vld [vmem:[%s741_s1] ss:$8 sps:$4 sm:$0xff]   ;;  %v530_v3 = vld [vmem:[%s741_s1 + $0x14] ss:$8 sps:$4 sm:$0xff]  }
   0x2   :  { %143 = vmatprep.subr.bf16.mxu0 %v527_v0  ;;  %v532_v4 = vld [vmem:[%s741_s1 + $0x10] ss:$8 sps:$4 sm:$0xff]   ;;  %v533_v5 = vld [vmem:[%s741_s1 + $0x24] ss:$8 sps:$4 sm:$0xff]   ;;  %v535_v6 = vld [vmem:[%s741_s1 + $0x20] ss:$8 sps:$4 sm:$0xff]  }
   0x3   :  { %144 = vmatpush1.bf16.msra.mxu0 %v529_v2  ;;  %v536_v7 = vld [vmem:[%s741_s1 + $0x34] ss:$8 sps:$4 sm:$0xff]   ;;  %v538_v8 = vld [vmem:[%s741_s1 + $0x30] ss:$8 sps:$4 sm:$0xff]   ;;  %v539_v9 = vld [vmem:[%s741_s1 + $0x44] ss:$8 sps:$4 sm:$0xff]  }
   0x4   :  { %145 = vmatprep.subr.bf16.mxu0 %v530_v3  ;;  %v541_v10 = vld [vmem:[%s741_s1 + $0x40] ss:$8 sps:$4 sm:$0xff]   ;;  %v542_v11 = vld [vmem:[%s741_s1 + $0x54] ss:$8 sps:$4 sm:$0xff]   ;;  %v544_v12 = vld [vmem:[%s741_s1 + $0x50] ss:$8 sps:$4 sm:$0xff]  }
   0x5   :  { %v545_v13 = vld [vmem:[%s741_s1 + $0x64] ss:$8 sps:$4 sm:$0xff]   ;;  %v547_v14 = vld [vmem:[%s741_s1 + $0x60] ss:$8 sps:$4 sm:$0xff]   ;;  %v548_v15 = vld [vmem:[%s741_s1 + $0x74] ss:$8 sps:$4 sm:$0xff]  }
   0x6   :  { %v550_v16 = vld [vmem:[%s741_s1 + $0x70] ss:$8 sps:$4 sm:$0xff]   ;;  %v673_v17 = vld [vmem:[%s742_s0] sm:$0xff]   ;;  %v554_v20 = vld [vmem:[%s743_s3 + $0x48] sm:$0xff]   ;;  %v48_v35 = vshrl.u32 %v47_v34, 7 }
   0x7   :  { %146 = vmatpush1.bf16.msra.mxu0 %v532_v4  ;;  %v552_v18 = vld [vmem:[%s743_s3 + $0x40] sm:$0xff]   ;;  %v555_v21 = vld [vmem:[%s743_s3 + $0x8] sm:$0xff]   ;;  %v556_v22 = vld [vmem:[%s743_s3 + $0x50] sm:$0xff]  }
   0x8   :  { %147 = vmatprep.subr.bf16.mxu0 %v533_v5  ;;  %v553_v19 = vld [vmem:[%s743_s3] sm:$0xff]   ;;  %504 = vmatprep.subr.bf16.mxu1 %v552_v18  ;;  %v557_v23 = vld [vmem:[%s743_s3 + $0x10] sm:$0xff]   ;;  %v558_v24 = vld [vmem:[%s743_s3 + $0x58] sm:$0xff]   ;;  %v49_v36 = vsub.s32 0, %v48_v35  ;;  %v53_v38 = vsub.s32 1, %v48_v35  ;;  %v401_v35 = vunpack.c.h.bf16 %v673_v17 }
   0x9   :  { %505 = vmatpush3.bf16.msra.mxu1 %v553_v19  ;;  %v559_v25 = vld [vmem:[%s743_s3 + $0x18] sm:$0xff]   ;;  %v560_v26 = vld [vmem:[%s743_s3 + $0x60] sm:$0xff]   ;;  %v562_v28 = vld [vmem:[%s743_s3 + $0x68] sm:$0xff]  }
   0xa   :  { %506 = vmatprep.subr.bf16.mxu1 %v554_v20  ;;  %v561_v27 = vld [vmem:[%s743_s3 + $0x20] sm:$0xff]   ;;  %v563_v29 = vld [vmem:[%s743_s3 + $0x28] sm:$0xff]   ;;  %v564_v30 = vld [vmem:[%s743_s3 + $0x70] sm:$0xff]  }
   0xb   :  { %148 = vmatpush1.bf16.msra.mxu0 %v535_v6  ;;  %v565_v31 = vld [vmem:[%s743_s3 + $0x30] sm:$0xff]   ;;  %v566_v32 = vld [vmem:[%s743_s3 + $0x78] sm:$0xff]   ;;  %v45_v37 = vld [vmem:[%s744_s2] sm:$0x3] }
   0xc   :  { %149 = vmatprep.subr.bf16.mxu0 %v536_v7  ;;  %v567_v33 = vld [vmem:[%s743_s3 + $0x38] sm:$0xff]   ;;  %v50_v39 = vrot.slane %v45_v37, %v49_v36  ;;  %v54_v40 = vrot.slane %v45_v37, %v53_v38 }
   0xd   :  { %507 = vmatpush3.bf16.msra.mxu1 %v555_v21 }
   0xe   :  { %508 = vmatprep.subr.bf16.mxu1 %v556_v22 }
   0xf   :  { %150 = vmatpush1.bf16.msra.mxu0 %v538_v8 }
  0x10   :  { %151 = vmatprep.subr.bf16.mxu0 %v539_v9 }
  0x11   :  { %509 = vmatpush3.bf16.msra.mxu1 %v557_v23 }
  0x12   :  { %510 = vmatprep.subr.bf16.mxu1 %v558_v24 }
  0x13   :  { %152 = vmatpush1.bf16.msra.mxu0 %v541_v10 }
  0x14   :  { %153 = vmatprep.subr.bf16.mxu0 %v542_v11 }
  0x15   :  { %511 = vmatpush3.bf16.msra.mxu1 %v559_v25  ;;  %v476_v25 = vld [vmem:[%s745_s4] ss:$0 sm:$0xff] }
  0x16   :  { %512 = vmatprep.subr.bf16.mxu1 %v560_v26 }
  0x17   :  { %154 = vmatpush1.bf16.msra.mxu0 %v544_v12 }
  0x18   :  { %155 = vmatprep.subr.bf16.mxu0 %v545_v13 }
  0x19   :  { %513 = vmatpush3.bf16.msra.mxu1 %v561_v27 }
  0x1a   :  { %514 = vmatprep.subr.bf16.mxu1 %v562_v28 }
  0x1b   :  { %156 = vmatpush1.bf16.msra.mxu0 %v547_v14 }
  0x1c   :  { %157 = vmatprep.subr.bf16.mxu0 %v548_v15 }
  0x1d   :  { %515 = vmatpush3.bf16.msra.mxu1 %v563_v29  ;;  %v400_v29 = vunpack.c.l.bf16 %v673_v17 }
  0x1e   :  { %516 = vmatprep.subr.bf16.mxu1 %v564_v30 }
  0x1f   :  { %158 = vmatpush1.bf16.msra.mxu0 %v550_v16 }
  0x21   :  { %517 = vmatpush3.bf16.msra.mxu1 %v565_v31 }
  0x22   :  { %176 = vmatmul.mubr.bf16.vlgmr.msra.gmra.mrb[0].mxu0 %v673_v17  ;;  %518 = vmatprep.subr.bf16.mxu1 %v566_v32 }
  0x25   :  { %519 = vmatpush3.bf16.msra.mxu1 %v567_v33 }
  0xf5   :  { %v177_v41 = vpop.f32.mrb[0].mxu0 }
  0xf6   :  { %v178_v42 = vadd.f32 %v177_v41, %v50_v39  ;;  %v179_v43 = vpop.f32.mrb[1].mxu0 }
  0xf7   :  { %v180_v44 = vadd.f32 %v179_v43, %v54_v40  ;;  %v181_v45 = vpop.f32.mrb[2].mxu0 }
  0xf8   :  { %v186_v46 = vmul.f32 %v178_v42, %v178_v42  ;;  %v182_v47 = vadd.f32 %v181_v45, %v50_v39  ;;  %v183_v48 = vpop.f32.mrb[3].mxu0 }
  0xf9   :  { %v187_v49 = vmul.f32 %v180_v44, %v180_v44  ;;  %v184_v50 = vadd.f32 %v183_v48, %v54_v40 }
  0xfa   :  { %v190_v51 = vmul.f32 %v186_v46, %v178_v42  ;;  %v188_v52 = vmul.f32 %v182_v47, %v182_v47 }
  0xfb   :  { %v191_v53 = vmul.f32 %v187_v49, %v180_v44  ;;  %v189_v54 = vmul.f32 %v184_v50, %v184_v50 }
  0xfc   :  { %v194_v55 = vmul.f32 0.044715, %v190_v51  ;;  %v192_v56 = vmul.f32 %v188_v52, %v182_v47  ;;  %v493_v52 = vld [vmem:[%s746_s5] ss:$0 sm:$0xff] }
  0xfd   :  { %v195_v57 = vmul.f32 0.044715, %v191_v53  ;;  %v193_v58 = vmul.f32 %v189_v54, %v184_v50 }
  0xfe   :  { %v198_v59 = vadd.f32 %v194_v55, %v178_v42  ;;  %v196_v60 = vmul.f32 0.044715, %v192_v56  ;;  %v494_v56 = vld [vmem:[%s747_s6] ss:$0 sm:$0xff] }
  0xff   :  { %v197_v61 = vmul.f32 0.044715, %v193_v58  ;;  %v199_v62 = vadd.f32 %v195_v57, %v180_v44 }
 0x100   :  { %v202_v63 = vmul.f32 0.7978846, %v198_v59  ;;  %v200_v0 = vadd.f32 %v196_v60, %v182_v47 }
 0x101   :  { %v201_v1 = vadd.f32 %v197_v61, %v184_v50  ;;  %v203_v2 = vmul.f32 0.7978846, %v199_v62 }
 0x102   :  { %569 = vtanh.f32 %v202_v63  ;;  %v204_v3 = vmul.f32 0.7978846, %v200_v0 }
 0x103   :  { %v205_v4 = vmul.f32 0.7978846, %v201_v1  ;;  %571 = vtanh.f32 %v203_v2 }
 0x104   :  { %573 = vtanh.f32 %v204_v3 }
 0x105   :  { %575 = vtanh.f32 %v205_v4 }
 0x10c   :  { %v570_v5 = vpop.eup %569 }
 0x10d   :  { %v572_v6 = vpop.eup %571  ;;  %v210_v7 = vadd.f32 1.0, %v570_v5 }
 0x10e   :  { %v574_v8 = vpop.eup %573  ;;  %v211_v9 = vadd.f32 1.0, %v572_v6 }
 0x10f   :  { %v576_v10 = vpop.eup %575  ;;  %v212_v11 = vadd.f32 1.0, %v574_v8  ;;  %v214_v12 = vmul.f32 0.5, %v210_v7 }
 0x110   :  { %v213_v13 = vadd.f32 1.0, %v576_v10  ;;  %v215_v14 = vmul.f32 0.5, %v211_v9 }
 0x111   :  { %v216_v15 = vmul.f32 0.5, %v212_v11  ;;  %v218_v18 = vmul.f32 %v214_v12, %v178_v42 }
 0x112   :  { %v217_v16 = vmul.f32 0.5, %v213_v13  ;;  %v219_v20 = vmul.f32 %v215_v14, %v180_v44 }
 0x113   :  { %v220_v19 = vmul.f32 %v216_v15, %v182_v47 }
 0x114   :  { %v221_v21 = vmul.f32 %v217_v16, %v184_v50 }
 0x115   :  { %v222_v22 = vpack.c.bf16 %v220_v19, %v218_v18 }
 0x116   :  { %v223_v23 = vpack.c.bf16 %v221_v21, %v219_v20 }
 0x118   :  { %391 = vmatprep.mubr.bf16.mxu1 %v223_v23 }
 0x119   :  { %392 = vmatmul.mubr.bf16.vlgmr.msra.gmra.mrb[0].mxu1 %v222_v22 }
 0x1ec   :  { %v520_v24 = vpop.f32.mrb[0].mxu1 }
 0x1ed   :  { %v521_v26 = vpop.f32.mrb[1].mxu1 }
 0x1ee   :  { %v522_v27 = vadd.f32 %v521_v26, %v520_v24  ;;  %v523_v28 = vpop.f32.mrb[2].mxu1 }
 0x1ef   :  { %v524_v30 = vpop.f32.mrb[3].mxu1 }
 0x1f0   :  { %v394_v31 = vadd.f32 %v522_v27, %v476_v25  ;;  %v525_v32 = vadd.f32 %v524_v30, %v523_v28 }
 0x1f2   :  { %v397_v33 = vadd.f32 %v525_v32, %v476_v25  ;;  %v402_v34 = vadd.f32 %v400_v29, %v394_v31 }
 0x1f4   :  { %404 = vadd.xlane.f32.xlu0 %v402_v34  ;;  %v403_v36 = vadd.f32 %v401_v35, %v397_v33 }
 0x1f8   :  { %406 = vadd.xlane.f32.xlu0 %v403_v36 }
 0x281   :  { %v405_v37 = vpop.xlane.xlu0 %404 }
 0x282   :  { %v409_v38 = vmul.f32 0.0078125, %v405_v37 }
 0x284   :  { %v411_v39 = vsub.f32 %v402_v34, %v409_v38 }
 0x285   :  { %v407_v40 = vpop.xlane.xlu0 %406 }
 0x286   :  { %v410_v41 = vmul.f32 0.0078125, %v407_v40  ;;  %v413_v42 = vmul.f32 %v411_v39, %v411_v39 }
 0x288   :  { %v412_v43 = vsub.f32 %v403_v36, %v410_v41  ;;  %415 = vadd.xlane.f32.xlu1 %v413_v42 }
 0x28a   :  { %v414_v44 = vmul.f32 %v412_v43, %v412_v43 }
 0x28c   :  { %417 = vadd.xlane.f32.xlu1 %v414_v44 }
 0x315   :  { %v416_v45 = vpop.xlane.xlu1 %415 }
 0x316   :  { %v419_v46 = vmul.f32 0.0078125, %v416_v45 }
 0x318   :  { %v421_v47 = vadd.f32 1e-12, %v419_v46 }
 0x319   :  { %v418_v48 = vpop.xlane.xlu1 %417 }
 0x31a   :  { %577 = vrsqrt.f32 %v421_v47  ;;  %v420_v49 = vmul.f32 0.0078125, %v418_v48 }
 0x31c   :  { %v422_v17 = vadd.f32 1e-12, %v420_v49 }
 0x31e   :  { %579 = vrsqrt.f32 %v422_v17 }
 0x324   :  { %v578_v50 = vpop.eup %577 }
 0x325   :  { %v425_v51 = vmul.f32 %v578_v50, %v411_v39 }
 0x327   :  { %v434_v54 = vmul.f32 %v493_v52, %v425_v51 }
 0x328   :  { %v580_v53 = vpop.eup %579 }
 0x329   :  { %v426_v55 = vmul.f32 %v580_v53, %v412_v43  ;;  %v443_v58 = vadd.f32 %v494_v56, %v434_v54 }
 0x32b   :  { %v435_v57 = vmul.f32 %v493_v52, %v426_v55 }
 0x32d   :  { %v444_v59 = vadd.f32 %v494_v56, %v435_v57 }
 0x32f   :  { %v502_v60 = vpack.c.bf16 %v444_v59, %v443_v58 }
 0x331   :  { %503 = vst [vmem:[%s748_s7] sm:$0xff] %v502_v60  }

// kernel: explainable_model_forward.9
= control target key start
LH: loop header
LB: loop body
LE: loop exit
PB: predicated region body
PF: predicated region fallthrough
CT: control target
= control target key end

     0   :  { %s1696_s27 = smov 0   ;;  %s1958_s0 = inlined_call_operand.vmem [shape: bf16[2,8,128], index: 0, kind: input, shape index: {}]   ;;  %s1959_s1 = inlined_call_operand.vmem [shape: f32[2,1,8], index: 1, kind: input, shape index: {}]   ;;  %s1960_s2 = inlined_call_operand.vmem [shape: bf16[128,384], index: 2, kind: input, shape index: {}]   ;;  %s1961_s3 = inlined_call_operand.vmem [shape: f32[1,384], index: 3, kind: input, shape index: {}]   ;;  %s1962_s4 = inlined_call_operand.vmem [shape: bf16[128,128], index: 4, kind: input, shape index: {}]   ;;  %s1963_s5 = inlined_call_operand.vmem [shape: f32[1,128], index: 5, kind: input, shape index: {}]   ;;  %s1964_s6 = inlined_call_operand.vmem [shape: f32[1,128], index: 6, kind: input, shape index: {}]   ;;  %s1965_s7 = inlined_call_operand.vmem [shape: f32[1,128], index: 7, kind: input, shape index: {}]   ;;  %s1966_s8 = inlined_call_operand.vmem [shape: bf16[2,8,128], index: 8, kind: output, shape index: {}]  }
   0x1 LB: > { %s1371_s28 = sadd.s32 4294967295, %s1643_s27   ;;  %p1375_p0 = scmp.ge.s32.totalorder %s1643_s27, 1  ;;  %s1643_s27 = sphi %s1696_s27, %s18_s27  }
   0x2   : > { %p269_p1 = scmp.lt.s32.totalorder %s1643_s27, 3 }
   0x4   : > { %p270_p2 = pnand %p1375_p0, %p269_p1 }
   0x5   : > { %v1579_v0 = vld [vmem:[%s1960_s2 + $0x4] ss:$12 sps:$4 sm:$0xff] (!%p270_p2)   ;;  %v1581_v1 = vld [vmem:[%s1960_s2] ss:$12 sps:$4 sm:$0xff] (!%p270_p2)   ;;  %v1645_v2 = vmov (!%p270_p2), 0   ;;  %p304_p3 = scmp.lt.s32.totalorder (!%p270_p2), %s1371_s28, 1  ;;  %v353_v19 = vlaneseq (!%p270_p2) }
   0x6   : > { %273 = sbr.rel (%p270_p2) target bundleno = 2944 (0xb80), region = 52  ;;  %528 = vmatprep.mubr.bf16.mxu0 (!%p270_p2), %v1645_v2  ;;  %496 = vmatprep.subr.bf16.mxu0 (!%p270_p2), %v1579_v0  ;;  %v1582_v3 = vld [vmem:[%s1960_s2 + $0x1c] ss:$12 sps:$4 sm:$0xff] (!%p270_p2)   ;;  %v1584_v4 = vld [vmem:[%s1960_s2 + $0x18] ss:$12 sps:$4 sm:$0xff] (!%p270_p2)   ;;  %v1646_v18 = vmov (!%p270_p2), 0.0  }
   0x7   : > { %497 = vmatpush1.bf16.msra.mxu0 (!%p270_p2), %v1581_v1  ;;  %v1585_v5 = vld [vmem:[%s1960_s2 + $0x34] ss:$12 sps:$4 sm:$0xff] (!%p270_p2)   ;;  %v1587_v6 = vld [vmem:[%s1960_s2 + $0x30] ss:$12 sps:$4 sm:$0xff] (!%p270_p2)   ;;  %v1588_v7 = vld [vmem:[%s1960_s2 + $0x4c] ss:$12 sps:$4 sm:$0xff] (!%p270_p2)   ;;  %1465 = vmatprep.subr.bf16.mxu1 (!%p270_p2), %v1646_v18 }
   0x8   : > { %498 = vmatprep.subr.bf16.mxu0 (!%p270_p2), %v1582_v3  ;;  %v1590_v8 = vld [vmem:[%s1960_s2 + $0x48] ss:$12 sps:$4 sm:$0xff] (!%p270_p2)   ;;  %v1591_v9 = vld [vmem:[%s1960_s2 + $0x64] ss:$12 sps:$4 sm:$0xff] (!%p270_p2)   ;;  %v1593_v10 = vld [vmem:[%s1960_s2 + $0x60] ss:$12 sps:$4 sm:$0xff] (!%p270_p2)  }
   0x9   : > { %v1594_v11 = vld [vmem:[%s1960_s2 + $0x7c] ss:$12 sps:$4 sm:$0xff] (!%p270_p2)   ;;  %v1596_v12 = vld [vmem:[%s1960_s2 + $0x78] ss:$12 sps:$4 sm:$0xff] (!%p270_p2)   ;;  %v1597_v13 = vld [vmem:[%s1960_s2 + $0x94] ss:$12 sps:$4 sm:$0xff] (!%p270_p2)  }
   0xa   : > { %v1599_v14 = vld [vmem:[%s1960_s2 + $0x90] ss:$12 sps:$4 sm:$0xff] (!%p270_p2)   ;;  %v1600_v15 = vld [vmem:[%s1960_s2 + $0xac] ss:$12 sps:$4 sm:$0xff] (!%p270_p2)   ;;  %v1602_v16 = vld [vmem:[%s1960_s2 + $0xa8] ss:$12 sps:$4 sm:$0xff] (!%p270_p2)  }
   0xb   : > { %499 = vmatpush1.bf16.msra.mxu0 (!%p270_p2), %v1584_v4  ;;  %vm1647_vm0 = vmmov (!%p270_p2), 0   ;;  %v1769_v20 = vshrl.u32 (!%p270_p2), %v353_v19, 7  ;;  %v1775_v22 = vld [vmem:[%s1961_s3] sm:$0x7] (!%p270_p2)  ;;  %vm603_vm1 = vcmask (!%p270_p2), 261120   ;;  %s1648_s25 = smov (!%p270_p2), 96  }
   0xc   : > { %500 = vmatprep.subr.bf16.mxu0 (!%p270_p2), %v1585_v5  ;;  %1481 = vmatprep.mubr.msk.bf16.mxu1 (!%p270_p2), %vm1647_vm0, %v1646_v18  ;;  %v1603_v36 = vld [vmem:[%s1960_s2 + $0x8] ss:$12 sps:$4 sm:$0xff] (!%p270_p2)   ;;  %v1604_v37 = vld [vmem:[%s1960_s2 + $0x20] ss:$12 sps:$4 sm:$0xff] (!%p270_p2)   ;;  %v1605_v38 = vld [vmem:[%s1960_s2 + $0x38] ss:$12 sps:$4 sm:$0xff] (!%p270_p2)  }
   0xd   : > { %s1968_s28 = smov (!%p304_p3, %s1371_s28), 1  ;;  %v355_v21 = vsub.s32 0, %v1769_v20  ;;  %v359_v23 = vsub.s32 1, %v1769_v20  ;;  %1466 = vmatpush3.bf16.msra.mxu1 %v1603_v36  ;;  %v1606_v39 = vld [vmem:[%s1960_s2 + $0x50] ss:$12 sps:$4 sm:$0xff]   ;;  %vm650_vm2 = vcmask 64512  }
   0xe   : > { %s1376_s17 = sshll.u32 %s1968_s28, 2  ;;  %1467 = vmatprep.subr.bf16.mxu1 %v1646_v18  ;;  %v1607_v40 = vld [vmem:[%s1960_s2 + $0x68] ss:$12 sps:$4 sm:$0xff]   ;;  %v1608_v41 = vld [vmem:[%s1960_s2 + $0x80] ss:$12 sps:$4 sm:$0xff]   ;;  %s310_s26 = scalar_lea.vmem %s1959_s1, %s1968_s28  ;;  %v363_v5 = vsub.s32 2, %v1769_v20 }
   0xf   : > { %501 = vmatpush1.bf16.msra.mxu0 %v1587_v6  ;;  %s307_s22 = scalar_lea.vmem %s1958_s0, %s1376_s17  ;;  %v356_v24 = vrot.slane %v1775_v22, %v355_v21  ;;  %v360_v25 = vrot.slane %v1775_v22, %v359_v23  ;;  %v1609_v44 = vld [vmem:[%s1960_s2 + $0x98] ss:$12 sps:$4 sm:$0xff]   ;;  %v1610_v45 = vld [vmem:[%s1960_s2 + $0xb0] ss:$12 sps:$4 sm:$0xff]   ;;  %v1839_v47 = vld [vmem:[%s310_s26] ss:$0 sm:$0xff]  ;;  %s314_s13 = scalar_lea.vmem %s1966_s8, %s1376_s17 }
  0x10   : > { %502 = vmatprep.subr.bf16.mxu0 %v1588_v7  ;;  %v1760_v17 = vld [vmem:[%s307_s22] sm:$0xf]  ;;  %v364_v6 = vrot.slane %v1775_v22, %v363_v5  ;;  %s1649_s29 = smov 64   ;;  %vm666_vm3 = vcmask 1043456   ;;  %v1613_v21 = vld [vmem:[%s1962_s4 + $0x10] sm:$0xff]   ;;  %v1614_v22 = vld [vmem:[%s1962_s4 + $0x18] sm:$0xff]  }
  0x11   : > { %1468 = vmatpush3.bf16.msra.mxu1 %v1604_v37  ;;  %s1650_s15 = smov 32   ;;  %v1615_v5 = vld [vmem:[%s1962_s4 + $0x20] sm:$0xff]  }
  0x12   : > { %1469 = vmatprep.subr.bf16.mxu1 %v1646_v18 }
  0x13   : > { %503 = vmatpush1.bf16.msra.mxu0 %v1590_v8 }
  0x14   : > { %504 = vmatprep.subr.bf16.mxu0 %v1591_v9 }
  0x15   : > { %1470 = vmatpush3.bf16.msra.mxu1 %v1605_v38 }
  0x16   : > { %1471 = vmatprep.subr.bf16.mxu1 %v1646_v18 }
  0x17   : > { %505 = vmatpush1.bf16.msra.mxu0 %v1593_v10 }
  0x18   : > { %506 = vmatprep.subr.bf16.mxu0 %v1594_v11 }
  0x19   : > { %1472 = vmatpush3.bf16.msra.mxu1 %v1606_v39 }
  0x1a   : > { %1473 = vmatprep.subr.bf16.mxu1 %v1646_v18 }
  0x1b   : > { %507 = vmatpush1.bf16.msra.mxu0 %v1596_v12 }
  0x1c   : > { %508 = vmatprep.subr.bf16.mxu0 %v1597_v13 }
  0x1d   : > { %1474 = vmatpush3.bf16.msra.mxu1 %v1607_v40 }
  0x1e   : > { %1475 = vmatprep.subr.bf16.mxu1 %v1646_v18 }
  0x1f   : > { %509 = vmatpush1.bf16.msra.mxu0 %v1599_v14 }
  0x20   : > { %510 = vmatprep.subr.bf16.mxu0 %v1600_v15 }
  0x21   : > { %1476 = vmatpush3.bf16.msra.mxu1 %v1608_v41 }
  0x22   : > { %1477 = vmatprep.subr.bf16.mxu1 %v1646_v18 }
  0x23   : > { %511 = vmatpush1.bf16.msra.mxu0 %v1602_v16 }
  0x24   : > { %1485 = vmatprep.subr.bf16.mxu0 %v1646_v18 }
  0x25   : > { %1478 = vmatpush3.bf16.msra.mxu1 %v1609_v44 }
  0x26   : > { %529 = vmatmul.mubr.bf16.vlgmr.msra.gmra.mrb[0].mxu0 %v1760_v17  ;;  %1479 = vmatprep.subr.bf16.mxu1 %v1646_v18 }
  0x27   : > { %1487 = vmatprep.mubr.msk.bf16.mxu0 %vm1647_vm0, %v1646_v18 }
  0x29   : > { %1480 = vmatpush3.bf16.msra.mxu1 %v1610_v45 }
  0x2a   : > { %1491 = vmatprep.subr.bf16.mxu1 %v1646_v18 }
  0x2c   : > { %1482 = vmatmul.mubr.bf16.vlgmr.msra.gmra.mrb[0].mxu1 %v1760_v17 }
  0x2d   : > { %1493 = vmatprep.mubr.msk.bf16.mxu1 %vm1647_vm0, %v1646_v18 }
  0xf9   : > { %v530_v26 = vpop.f32.mrb[0].mxu0 }
  0xfa   : > { %v531_v27 = vadd.f32 %v530_v26, %v356_v24  ;;  %v532_v28 = vpop.f32.mrb[1].mxu0 }
  0xfb   : > { %v533_v29 = vadd.f32 %v532_v28, %v360_v25  ;;  %v534_v30 = vpop.f32.mrb[2].mxu0  ;;  %v1611_v28 = vld [vmem:[%s1962_s4] sm:$0xff]  }
  0xfc   : > { %v535_v31 = vpop.f32.mrb[3].mxu0  ;;  %v577_v32 = vpack.c.bf16 %v531_v27, %v531_v27  ;;  %v1612_v30 = vld [vmem:[%s1962_s4 + $0x8] sm:$0xff]  }
  0xfd   : > { %v1780_v33 = vpack.c.bf16 %v533_v29, %v533_v29 }
  0xfe   : > { %v1786_v35 = vmul.bf16 1043676725, %v577_v32 }
  0xff   : > { %715 = vrot.lane.b32.xlu0 %v1780_v33, %s1648_s25  ;;  %v608_v34 = vsel %vm603_vm1, %v1780_v33, 0  ;;  %v571_v63 = vpop.f32.mrb[0].mxu1 }
 0x100   : > { %1486 = vmatpush3.bf16.xpose.msra.mxu0 %v608_v34  ;;  %v1483_v0 = vpop.f32.mrb[1].mxu1  ;;  %v572_v7 = vadd.f32 %v571_v63, %v364_v6 }
 0x101   : > { %1497 = vmatprep.subr.bf16.mxu0 %v1646_v18  ;;  %v574_v1 = vpop.f32.mrb[2].mxu1 }
 0x102   : > { %v1484_v2 = vpop.f32.mrb[3].mxu1  ;;  %v1848_v8 = vpack.c.bf16 %v572_v7, %v572_v7 }
 0x103   : > { %712 = vrot.lane.b32.xlu0 %v1786_v35, %s1648_s25 }
 0x104   : > { %v668_v9 = vsel %vm666_vm3, %v1848_v8, 0 }
 0x105   : > { %1492 = vmatpush3.bf16.msra.mxu1 %v668_v9 }
 0x106   : > { %1503 = vmatprep.subr.bf16.mxu1 %v1646_v18 }
 0x107   : > { %1488 = vmatmul.mubr.msk.bf16.vlgmr.msra.gmra.mrb[4].mxu0 %vm603_vm1, %v1786_v35 }
 0x108   : > { %1499 = vmatprep.mubr.msk.bf16.mxu0 %vm1647_vm0, %v1646_v18 }
 0x171   : > { %v716_v42 = vpop.permute.xlu0 %715 }
 0x172   : > { %v721_v43 = vsel %vm603_vm1, %v716_v42, 0 }
 0x173   : > { %1498 = vmatpush3.bf16.xpose.msra.mxu0 %v721_v43 }
 0x174   : > { %1509 = vmatprep.subr.bf16.mxu0 %v1646_v18 }
 0x175   : > { %v713_v46 = vpop.permute.xlu0 %712 }
 0x17a   : > { %1500 = vmatmul.mubr.msk.bf16.vlgmr.msra.gmra.mrb[8].mxu0 %vm603_vm1, %v713_v46 }
 0x17b   : > { %1513 = vmatprep.mubr.msk.bf16.mxu0 %vm1647_vm0, %v1646_v18  ;;  %1510 = vmatpush3.bf16.msra.mxu0 %v1613_v21 }
 0x17c   : > { %1511 = vmatprep.subr.bf16.mxu0 %v1646_v18 }
 0x17f   : > { %1512 = vmatpush3.bf16.msra.mxu0 %v1614_v22 }
 0x180   : > { %1525 = vmatprep.subr.bf16.mxu0 %v1646_v18 }
 0x1da   : > { %v644_v48 = vpop.f32.mrb[4].mxu0 }
 0x1db   : > { %v645_v49 = vadd.f32 %v1839_v47, %v644_v48  ;;  %v1489_v50 = vpop.f32.mrb[5].mxu0 }
 0x1dc   : > { %v647_v51 = vpop.f32.mrb[6].mxu0 }
 0x1dd   : > { %v1490_v52 = vpop.f32.mrb[7].mxu0  ;;  %v651_v53 = vsel %vm650_vm2, %v645_v49, -inf }
 0x1de   : > { %652 = vmax.xlane.f32.xlu1 %v651_v53 }
 0x24d   : > { %v757_v54 = vpop.f32.mrb[8].mxu0 }
 0x24e   : > { %v758_v55 = vadd.f32 %v1839_v47, %v757_v54  ;;  %v1501_v56 = vpop.f32.mrb[9].mxu0 }
 0x24f   : > { %v760_v57 = vpop.f32.mrb[10].mxu0 }
 0x250   : > { %v1502_v58 = vpop.f32.mrb[11].mxu0  ;;  %v763_v59 = vsel %vm650_vm2, %v758_v55, -inf }
 0x251   : > { %764 = vmax.xlane.f32.xlu1 %v763_v59 }
 0x26b   : > { %v653_v60 = vpop.xlane.xlu1 %652 }
 0x26c   : > { %v654_v61 = vsub.f32 %v645_v49, %v653_v60 }
 0x26e   : > { %v655_v62 = vmul.f32 1.442695, %v654_v61 }
 0x270   : > { %1619 = vpow2.f32 %v655_v62 }
 0x27a   : > { %v1620_v3 = vpop.eup %1619 }
 0x27b   : > { %v657_v4 = vsel %vm650_vm2, %v1620_v3, 0.0 }
 0x27c   : > { %658 = vadd.xlane.f32.xlu0 %v657_v4 }
 0x292   : > { %997 = vrot.lane.b32.xlu0 %v1848_v8, %s1649_s29 }
 0x2de   : > { %v765_v10 = vpop.xlane.xlu1 %764 }
 0x2df   : > { %v766_v11 = vsub.f32 %v758_v55, %v765_v10 }
 0x2e1   : > { %v767_v12 = vmul.f32 1.442695, %v766_v11 }
 0x2e3   : > { %1621 = vpow2.f32 %v767_v12 }
 0x2ed   : > { %v1622_v13 = vpop.eup %1621 }
 0x2ee   : > { %v769_v14 = vsel %vm650_vm2, %v1622_v13, 0.0 }
 0x2ef   : > { %770 = vadd.xlane.f32.xlu1 %v769_v14 }
 0x300   : > { %776 = vrot.lane.b32.xlu1 %v1848_v8, %s1648_s25 }
 0x304   : > { %937 = vrot.lane.b32.xlu1 %v1780_v33, %s1649_s29 }
 0x308   : > { %935 = vrot.lane.b32.xlu1 %v1786_v35, %s1649_s29 }
 0x309   : > { %v659_v15 = vpop.xlane.xlu0 %658 }
 0x30a   : > { %1623 = vrcp.f32 %v659_v15 }
 0x30d   : > { %v998_v31 = vpop.permute.xlu0 %997 }
 0x30e   : > { %v1003_v38 = vsel %vm666_vm3, %v998_v31, 0 }
 0x314   : > { %v1624_v16 = vpop.eup %1623 }
 0x315   : > { %v661_v19 = vmul.f32 %v1624_v16, %v1620_v3 }
 0x317   : > { %v662_v20 = vpack.c.bf16 %v661_v19, %v661_v19 }
 0x319   : > { %1494 = vmatmul.mubr.msk.bf16.vlgmr.msra.gmra.mrb[4].mxu1 %vm650_vm2, %v662_v20 }
 0x31a   : > { %1505 = vmatprep.mubr.msk.bf16.mxu1 %vm1647_vm0, %v1646_v18 }
 0x37c   : > { %v771_v23 = vpop.xlane.xlu1 %770 }
 0x37d   : > { %1625 = vrcp.f32 %v771_v23 }
 0x380   : > { %v777_v24 = vpop.permute.xlu1 %776 }
 0x381   : > { %v782_v25 = vsel %vm666_vm3, %v777_v24, 0 }
 0x382   : > { %1504 = vmatpush3.bf16.msra.mxu1 %v782_v25 }
 0x383   : > { %1517 = vmatprep.subr.bf16.mxu1 %v1646_v18 }
 0x384   : > { %v938_v40 = vpop.permute.xlu1 %937 }
 0x385   : > { %v943_v45 = vsel %vm603_vm1, %v938_v40, 0 }
 0x387   : > { %v1626_v26 = vpop.eup %1625 }
 0x388   : > { %v773_v27 = vmul.f32 %v1626_v26, %v1622_v13  ;;  %v936_v48 = vpop.permute.xlu1 %935 }
 0x38a   : > { %v774_v29 = vpack.c.bf16 %v773_v27, %v773_v27 }
 0x38c   : > { %1506 = vmatmul.mubr.msk.bf16.vlgmr.msra.gmra.mrb[8].mxu1 %vm650_vm2, %v774_v29 }
 0x38d   : > { %1518 = vmatpush3.bf16.msra.mxu1 %v1611_v28  ;;  %1521 = vmatprep.mubr.msk.bf16.mxu1 %vm1647_vm0, %v1646_v18 }
 0x38e   : > { %1519 = vmatprep.subr.bf16.mxu1 %v1646_v18 }
 0x391   : > { %1520 = vmatpush3.bf16.msra.mxu1 %v1612_v30 }
 0x392   : > { %1531 = vmatprep.subr.bf16.mxu1 %v1646_v18 }
 0x3ec   : > { %v704_v32 = vpop.f32.mrb[4].mxu1 }
 0x3ed   : > { %v710_v34 = vpack.c.bf16 %v704_v32, %v704_v32  ;;  %v1495_v36 = vpop.f32.mrb[5].mxu1 }
 0x3ee   : > { %v707_v37 = vpop.f32.mrb[6].mxu1 }
 0x3ef   : > { %v1496_v39 = vpop.f32.mrb[7].mxu1  ;;  %1522 = vmatmul.mubr.msk.bf16.vlgmr.msra.gmra.mrb[12].mxu1 %vm603_vm1, %v710_v34 }
 0x3f0   : > { %1532 = vmatpush3.bf16.msra.mxu1 %v1003_v38  ;;  %1533 = vmatprep.mubr.msk.bf16.mxu1 %vm1647_vm0, %v1646_v18 }
 0x3f1   : > { %1545 = vmatprep.subr.bf16.mxu1 %v1646_v18 }
 0x45f   : > { %v818_v41 = vpop.f32.mrb[8].mxu1 }
 0x460   : > { %v824_v42 = vpack.c.bf16 %v818_v41, %v818_v41  ;;  %v1507_v43 = vpop.f32.mrb[9].mxu1 }
 0x461   : > { %v821_v44 = vpop.f32.mrb[10].mxu1 }
 0x462   : > { %v1508_v46 = vpop.f32.mrb[11].mxu1  ;;  %1514 = vmatmul.mubr.msk.bf16.vlgmr.msra.gmra.mrb[12].mxu0 %vm603_vm1, %v824_v42 }
 0x463   : > { %1526 = vmatpush3.bf16.xpose.msra.mxu0 %v943_v45  ;;  %1527 = vmatprep.mubr.msk.bf16.mxu0 %vm1647_vm0, %v1646_v18 }
 0x464   : > { %1537 = vmatprep.subr.bf16.mxu0 %v1646_v18 }
 0x46a   : > { %1528 = vmatmul.mubr.msk.bf16.vlgmr.msra.gmra.mrb[16].mxu0 %vm603_vm1, %v936_v48 }
 0x46b   : > { %1541 = vmatprep.mubr.msk.bf16.mxu0 %vm1647_vm0, %v1646_v18  ;;  %1538 = vmatpush3.bf16.msra.mxu0 %v1615_v5 }
 0x46c   : > { %1539 = vmatprep.subr.bf16.mxu0 %v1646_v18 }
 0x4c2   : > { %v929_v49 = vpop.f32.mrb[12].mxu1 }
 0x4c3   : > { %v1523_v50 = vpop.f32.mrb[13].mxu1 }
 0x4c4   : > { %v932_v51 = vpop.f32.mrb[14].mxu1  ;;  %v1423_v50 = vld [vmem:[%s1963_s5] ss:$0 sm:$0xff] }
 0x4c5   : > { %v1524_v52 = vpop.f32.mrb[15].mxu1 }
 0x535   : > { %v874_v53 = vpop.f32.mrb[12].mxu0 }
 0x536   : > { %v1896_v54 = vadd.f32 %v929_v49, %v874_v53  ;;  %v1515_v55 = vpop.f32.mrb[13].mxu0  ;;  %v1277_v53 = vunpack.c.l.bf16 %v1760_v17  ;;  %v1424_v17 = vld [vmem:[%s1964_s6] ss:$0 sm:$0xff] }
 0x537   : > { %v877_v56 = vpop.f32.mrb[14].mxu0 }
 0x538   : > { %v1516_v57 = vpop.f32.mrb[15].mxu0 }
 0x53d   : > { %v979_v58 = vpop.f32.mrb[16].mxu0 }
 0x53e   : > { %v980_v59 = vadd.f32 %v1839_v47, %v979_v58  ;;  %v1529_v60 = vpop.f32.mrb[17].mxu0 }
 0x53f   : > { %v982_v61 = vpop.f32.mrb[18].mxu0 }
 0x540   : > { %v1530_v62 = vpop.f32.mrb[19].mxu0  ;;  %v985_v63 = vsel %vm650_vm2, %v980_v59, -inf }
 0x541   : > { %986 = vmax.xlane.f32.xlu1 %v985_v63 }
 0x5ce   : > { %v987_v0 = vpop.xlane.xlu1 %986 }
 0x5cf   : > { %v988_v1 = vsub.f32 %v980_v59, %v987_v0 }
 0x5d1   : > { %v989_v2 = vmul.f32 1.442695, %v988_v1 }
 0x5d3   : > { %1627 = vpow2.f32 %v989_v2 }
 0x5dd   : > { %v1628_v3 = vpop.eup %1627 }
 0x5de   : > { %v991_v4 = vsel %vm650_vm2, %v1628_v3, 0.0 }
 0x5df   : > { %992 = vadd.xlane.f32.xlu0 %v991_v4 }
 0x5f5   : > { %1104 = vrot.lane.b32.xlu0 %v1780_v33, %s1650_s15 }
 0x5f9   : > { %1102 = vrot.lane.b32.xlu0 %v1786_v35, %s1650_s15  ;;  %v1616_v35 = vld [vmem:[%s1962_s4 + $0x28] sm:$0xff]  }
 0x5fa   : > { %1540 = vmatpush3.bf16.msra.mxu0 %v1616_v35 }
 0x5fb   : > { %1551 = vmatprep.subr.bf16.mxu0 %v1646_v18 }
 0x66c   : > { %v993_v6 = vpop.xlane.xlu0 %992 }
 0x66d   : > { %1629 = vrcp.f32 %v993_v6 }
 0x670   : > { %v1105_v10 = vpop.permute.xlu0 %1104 }
 0x671   : > { %v1110_v12 = vsel %vm603_vm1, %v1105_v10, 0 }
 0x674   : > { %v1103_v33 = vpop.permute.xlu0 %1102 }
 0x677   : > { %v1630_v7 = vpop.eup %1629 }
 0x678   : > { %v995_v9 = vmul.f32 %v1630_v7, %v1628_v3  ;;  %v1425_v3 = vld [vmem:[%s1965_s7] ss:$0 sm:$0xff] }
 0x67a   : > { %v996_v11 = vpack.c.bf16 %v995_v9, %v995_v9 }
 0x67c   : > { %1534 = vmatmul.mubr.msk.bf16.vlgmr.msra.gmra.mrb[16].mxu1 %vm650_vm2, %v996_v11 }
 0x67d   : > { %1546 = vmatpush3.bf16.xpose.msra.mxu1 %v1110_v12  ;;  %1547 = vmatprep.mubr.msk.bf16.mxu1 %vm1647_vm0, %v1646_v18 }
 0x67e   : > { %1557 = vmatprep.subr.bf16.mxu1 %v1646_v18 }
 0x684   : > { %1548 = vmatmul.mubr.msk.bf16.vlgmr.msra.gmra.mrb[20].mxu1 %vm603_vm1, %v1103_v33 }
 0x685   : > { %1561 = vmatprep.mubr.msk.bf16.mxu1 %vm1647_vm0, %v1646_v18 }
 0x74f   : > { %v1039_v13 = vpop.f32.mrb[16].mxu1 }
 0x750   : > { %v1045_v14 = vpack.c.bf16 %v1039_v13, %v1039_v13  ;;  %v1535_v15 = vpop.f32.mrb[17].mxu1 }
 0x751   : > { %v1042_v16 = vpop.f32.mrb[18].mxu1 }
 0x752   : > { %v1536_v19 = vpop.f32.mrb[19].mxu1  ;;  %1542 = vmatmul.mubr.msk.bf16.vlgmr.msra.gmra.mrb[20].mxu0 %vm603_vm1, %v1045_v14 }
 0x753   : > { %1553 = vmatprep.mubr.msk.bf16.mxu0 %vm1647_vm0, %v1646_v18 }
 0x757   : > { %v1146_v20 = vpop.f32.mrb[20].mxu1 }
 0x758   : > { %v1147_v21 = vadd.f32 %v1839_v47, %v1146_v20  ;;  %v1549_v22 = vpop.f32.mrb[21].mxu1  ;;  %v1617_v47 = vld [vmem:[%s1962_s4 + $0x30] sm:$0xff]  }
 0x759   : > { %v1149_v23 = vpop.f32.mrb[22].mxu1  ;;  %1558 = vmatpush3.bf16.msra.mxu1 %v1617_v47 }
 0x75a   : > { %v1550_v24 = vpop.f32.mrb[23].mxu1  ;;  %v1152_v25 = vsel %vm650_vm2, %v1147_v21, -inf  ;;  %1559 = vmatprep.subr.bf16.mxu1 %v1646_v18  ;;  %v1618_v18 = vld [vmem:[%s1962_s4 + $0x38] sm:$0xff]  }
 0x75b   : > { %1153 = vmax.xlane.f32.xlu0 %v1152_v25 }
 0x75d   : > { %1560 = vmatpush3.bf16.msra.mxu1 %v1618_v18 }
 0x7e8   : > { %v1154_v26 = vpop.xlane.xlu0 %1153 }
 0x7e9   : > { %v1155_v27 = vsub.f32 %v1147_v21, %v1154_v26 }
 0x7eb   : > { %v1156_v28 = vmul.f32 1.442695, %v1155_v27 }
 0x7ed   : > { %1631 = vpow2.f32 %v1156_v28 }
 0x7f7   : > { %v1632_v29 = vpop.eup %1631 }
 0x7f8   : > { %v1158_v30 = vsel %vm650_vm2, %v1632_v29, 0.0 }
 0x7f9   : > { %1159 = vadd.xlane.f32.xlu1 %v1158_v30 }
 0x80a   : > { %1164 = vrot.lane.b32.xlu1 %v1848_v8, %s1650_s15 }
 0x825   : > { %v1095_v31 = vpop.f32.mrb[20].mxu0 }
 0x826   : > { %v1101_v32 = vadd.f32 %v1095_v31, %v1896_v54  ;;  %v1543_v34 = vpop.f32.mrb[21].mxu0 }
 0x827   : > { %v1098_v36 = vpop.f32.mrb[22].mxu0 }
 0x828   : > { %v1544_v37 = vpop.f32.mrb[23].mxu0 }
 0x886   : > { %v1160_v38 = vpop.xlane.xlu1 %1159 }
 0x887   : > { %1633 = vrcp.f32 %v1160_v38 }
 0x88a   : > { %v1165_v39 = vpop.permute.xlu1 %1164 }
 0x88b   : > { %v1170_v40 = vsel %vm666_vm3, %v1165_v39, 0 }
 0x88c   : > { %1552 = vmatpush3.bf16.msra.mxu0 %v1170_v40 }
 0x891   : > { %v1634_v8 = vpop.eup %1633 }
 0x892   : > { %v1162_v41 = vmul.f32 %v1634_v8, %v1632_v29 }
 0x894   : > { %v1163_v42 = vpack.c.bf16 %v1162_v41, %v1162_v41 }
 0x896   : > { %1554 = vmatmul.mubr.msk.bf16.vlgmr.msra.gmra.mrb[24].mxu0 %vm650_vm2, %v1163_v42 }
 0x969   : > { %v1206_v43 = vpop.f32.mrb[24].mxu0 }
 0x96a   : > { %v1212_v44 = vpack.c.bf16 %v1206_v43, %v1206_v43  ;;  %v1555_v45 = vpop.f32.mrb[25].mxu0 }
 0x96b   : > { %v1209_v46 = vpop.f32.mrb[26].mxu0 }
 0x96c   : > { %v1556_v48 = vpop.f32.mrb[27].mxu0  ;;  %1562 = vmatmul.mubr.msk.bf16.vlgmr.msra.gmra.mrb[24].mxu1 %vm603_vm1, %v1212_v44 }
 0xa3f   : > { %v1262_v49 = vpop.f32.mrb[24].mxu1 }
 0xa40   : > { %v1268_v51 = vadd.f32 %v1262_v49, %v1101_v32  ;;  %v1563_v52 = vpop.f32.mrb[25].mxu1 }
 0xa41   : > { %v1265_v54 = vpop.f32.mrb[26].mxu1 }
 0xa42   : > { %v1276_v55 = vadd.f32 %v1423_v50, %v1268_v51  ;;  %v1564_v56 = vpop.f32.mrb[27].mxu1 }
 0xa44   : > { %v1278_v57 = vadd.f32 %v1277_v53, %v1276_v55 }
 0xa46   : > { %1279 = vadd.xlane.f32.xlu1 %v1278_v57 }
 0xad3   : > { %v1280_v58 = vpop.xlane.xlu1 %1279 }
 0xad4   : > { %v1282_v59 = vmul.f32 0.0078125, %v1280_v58 }
 0xad6   : > { %v1283_v60 = vsub.f32 %v1278_v57, %v1282_v59 }
 0xad8   : > { %v1284_v61 = vmul.f32 %v1283_v60, %v1283_v60 }
 0xada   : > { %1285 = vadd.xlane.f32.xlu0 %v1284_v61 }
 0xb67   : > { %v1286_v62 = vpop.xlane.xlu0 %1285 }
 0xb68   : > { %v1287_v63 = vmul.f32 0.0078125, %v1286_v62 }
 0xb6a   : > { %v1288_v0 = vadd.f32 1e-12, %v1287_v63 }
 0xb6c   : > { %1635 = vrsqrt.f32 %v1288_v0 }
 0xb76   : > { %v1636_v1 = vpop.eup %1635 }
 0xb77   : > { %v1290_v2 = vmul.f32 %v1636_v1, %v1283_v60 }
 0xb79   : > { %v1298_v4 = vmul.f32 %v1424_v17, %v1290_v2 }
 0xb7b   : > { %v1306_v5 = vadd.f32 %v1425_v3, %v1298_v4 }
 0xb7d   : > { %v1307_v6 = vpack.c.bf16 %v1306_v5, %v1306_v5 }
 0xb7f   : > { %1308 = vst [vmem:[%s314_s13] sm:$0xf] %v1307_v6 }
 0xb80 PF: > { %s18_s27 = sadd.s32 1, %s1643_s27  }
 0xb81   : > { %p15_p4 = scmp.ge.s32.totalorder %s18_s27, 4  }
 0xb83   :  { %17 = sbr.rel (!%p15_p4) target bundleno = 1 (0x1), region = 85 }

// kernel: explainable_model_forward.14
= control target key start
LH: loop header
LB: loop body
LE: loop exit
PB: predicated region body
PF: predicated region fallthrough
CT: control target
= control target key end

     0   :  { %s889_s0 = inlined_call_operand.vmem [shape: bf16[2,8,384], index: 0, kind: input, shape index: {}]   ;;  %s890_s1 = inlined_call_operand.vmem [shape: bf16[2,8,384], index: 1, kind: input, shape index: {}]   ;;  %s891_s2 = inlined_call_operand.vmem [shape: f32[1,128], index: 2, kind: input, shape index: {}]   ;;  %s892_s3 = inlined_call_operand.<no memory space> [shape: f32[1,1], index: 3, kind: input, shape index: {}]   ;;  %s893_s4 = inlined_call_operand.vmem [shape: f32[2,1,8], index: 4, kind: input, shape index: {}]   ;;  %s894_s5 = inlined_call_operand.vmem [shape: f32[2,1,128], index: 5, kind: output, shape index: {0}]   ;;  %s895_s6 = inlined_call_operand.hbm [shape: f32[2,1,8], index: 6, kind: output, shape index: {1}]  }
   0x1   :  { %v12_v0 = vstv %s892_s3 }
   0x2   :  { %13 = vst [vmem:[#allocation2] sm:$0x1] %v12_v0 }
   0x3   :  { %14 = vsyncpa [#allocation4], 0 }
   0x4   :  { %16 = vsyncpa [#allocation4 + $0x1], 0  ;;  %s775_s23 = smov 0   ;;  %s777_s24 = smov 0  }
   0x5   :  { %s779_s25 = smov 0   ;;  %s781_s26 = smov 0  }
   0x6 LB: > { %s796_s3 = sadd.s32 4294967295, %s731_s26   ;;  %s595_s27 = sadd.s32 4294967294, %s731_s26   ;;  %s731_s26 = sphi %s781_s26, %s901_s26   ;;  %s727_s25 = sphi %s779_s25, %s900_s25   ;;  %s723_s24 = sphi %s777_s24, %s899_s24   ;;  %s719_s23 = sphi %s775_s23, %s898_s23  }
   0x7   : > { %s800_s28 = sadd.s32 1, %s731_s26   ;;  %s175_s29 = sadd.s32 1, %s727_s25 }
   0x8   : > { %s172_s30 = ssub.s32 %s731_s26, %s800_s28  ;;  %p185_p0 = scmp.ne.s32.totalorder %s727_s25, %s723_s24 }
   0x9   : > { %p173_p1 = scmp.eq.s32.totalorder %s172_s30, 0  ;;  %p186_p2 = scmp.eq.s32.totalorder %s796_s3, 1 }
   0xa   : > { %p191_p3 = scmp.ne.s32.totalorder %s723_s24, %s719_s23  ;;  %p192_p4 = scmp.eq.s32.totalorder %s595_s27, 1 }
   0xb   : > { %s811_s7 = scalar_select %p173_p1, %s727_s25, %s175_s29  }
   0xc   : > { %p813_p5 = por %p186_p2, %p185_p0  ;;  %p817_p6 = por %p192_p4, %p191_p3 }
   0xd   : > { %p598_p7 = scmp.ge.s32.totalorder %s731_s26, 1  ;;  %p238_p8 = scmp.lt.s32.totalorder %s731_s26, 3 }
   0xf   : > { %p239_p9 = pnand %p598_p7, %p238_p8 }
  0x10   : > { %p278_p10 = scmp.lt.s32.totalorder (!%p239_p9), %s796_s3, 1  ;;  %v733_v1 = vmov (!%p239_p9), 0.0   ;;  %vm734_vm0 = vmmov (!%p239_p9), 0   ;;  %v311_v2 = vld [vmem:[#allocation2] sm:$0x1] (!%p239_p9)  ;;  %v735_v3 = vmov (!%p239_p9), 0   ;;  %v317_v21 = vlaneseq (!%p239_p9) }
  0x11   : > { %242 = sbr.rel (%p239_p9) target bundleno = 796 (0x31c), region = 40  ;;  %609 = vmatprep.subr.mxu0 (!%p239_p9), %v733_v1  ;;  %611 = vmatprep.mubr.msk.f32.mxu0 (!%p239_p9), %vm734_vm0, %v733_v1  ;;  %v310_v20 = vld [vmem:[%s891_s2] sm:$0x1] (!%p239_p9)  ;;  %vm393_vm1 = vcmask (!%p239_p9), 57344   ;;  %s276_s27 = sand.u32 (!%p239_p9), 1, %s723_s24   ;;  %vm405_vm2 = vcmask (!%p239_p9), 64512  }
  0x12   : > { %662 = vset.pattern.permute.xlu0 (!%p239_p9), %v735_v3  ;;  %614 = vmatprep.subr.mxu1 (!%p239_p9), %v733_v1  ;;  %v318_v22 = vshrl.u32 (!%p239_p9), %v317_v21, 7  ;;  %s277_s29 = scalar_lea.vmem (!%p239_p9), [#allocation3], %s276_s27  ;;  %s602_s30 = sshll.u32 (!%p239_p9), %s796_s3, 4 }
  0x13   : > { %314 = vperm.xlu0 (!%p239_p9), %662, %v311_v2   ;;  %616 = vmatprep.mubr.msk.f32.mxu1 (!%p239_p9), %vm734_vm0, %v733_v1  ;;  %s485_s15 = scalar_lea.sflag (!%p239_p9), [#allocation4], %s276_s27 }
  0x14   : > { %v319_v23 = vsub.s32 (!%p239_p9), 0, %v318_v22 }
  0x18   : > { %s825_s10 = scalar_select %p278_p10, %s796_s3, 1 }
  0x1a   : > { %s619_s11 = smul.u32 12, %s825_s10  ;;  %s290_s22 = scalar_lea.vmem %s893_s4, %s825_s10 }
  0x1b   : > { %v391_v27 = vld [vmem:[%s290_s22] sm:$0x1] }
  0x1c   : > { %s282_s14 = scalar_lea.vmem %s889_s0, %s619_s11  ;;  %s287_s17 = scalar_lea.vmem %s890_s1, %s619_s11 }
  0x1d   : > { %v294_v4 = vld [vmem:[%s282_s14] sm:$0xff]  ;;  %v295_v5 = vld [vmem:[%s282_s14 + $0x8] sm:$0xf]  ;;  %s500_s11 = sshll.u32 %s277_s29, 4  ;;  %s849_s14 = scalar_lea.hbm %s895_s6, %s602_s30  ;;  %s501_s11 = int_to_ptr.vmem [resolvable:$true] %s500_s11 }
  0x1e   : > { %v299_v6 = vld [vmem:[%s287_s17] sm:$0xff]  ;;  %v296_v7 = vunpack.c.l.bf16 %v294_v4  ;;  %v297_v8 = vunpack.c.h.bf16 %v294_v4  ;;  %v298_v9 = vunpack.c.l.bf16 %v295_v5  ;;  %v300_v10 = vld [vmem:[%s287_s17 + $0x8] sm:$0xf]  ;;  %s669_s16 = scalar_lea.vmem %s501_s11, 16  ;;  %s736_s17 = smov [#allocation3]  }
  0x1f   : > { %v301_v11 = vunpack.c.l.bf16 %v299_v6  ;;  %v302_v12 = vunpack.c.h.bf16 %v299_v6  ;;  %v303_v13 = vunpack.c.l.bf16 %v300_v10  ;;  %p670_p11 = scmp.ne.s32.totalorder %s501_s11, %s669_s16  ;;  %s673_s18 = sshll.u32 %s736_s17, 4  ;;  %s674_s18 = int_to_ptr.vmem [resolvable:$false] %s673_s18 }
  0x20   : > { %s675_s19 = scalar_lea.vmem %s674_s18, 32  ;;  %p676_p0 = scmp.lt.s32.totalorder %s501_s11, %s674_s18 }
  0x21   : > { %v305_v14 = vsub.f32 %v297_v8, %v301_v11  ;;  %v304_v15 = vadd.f32 %v303_v13, %v296_v7  ;;  %v307_v16 = vmul.f32 %v302_v12, %v298_v9  ;;  %p671_p12 = pnand %p670_p11, %p813_p5  ;;  %p677_p1 = scmp.lt.s32.totalorder %s675_s19, %s669_s16 }
  0x23   : > { %v306_v17 = vadd.f32 %v305_v14, %v304_v15  ;;  %p672_p13 = pneg %p671_p12  ;;  %p678_p2 = por %p677_p1, %p676_p0 }
  0x25   : > { %v308_v18 = vadd.f32 %v307_v16, %v306_v17  ;;  %p679_p3 = pnand %p678_p2, %p672_p13 }
  0x27   : > { %663 = vtanh.f32 %v308_v18 }
  0x31   : > { %v664_v19 = vpop.eup %663 }
  0x32   : > { %610 = vmatpush3.xpose.msra.mxu0 %v664_v19  ;;  %615 = vmatpush3.msra.mxu1 %v664_v19 }
  0x35   : > { %612 = vmatmul.mubr.f32.vlgmr.msra.gmra.mrb[0].mxu0 %v310_v20 }
  0x92   : > { %v315_v24 = vpop.permute.xlu0 %314 }
  0x93   : > { %v320_v25 = vrot.slane %v315_v24, %v319_v23 }
 0x108   : > { %v387_v26 = vpop.f32.mrb[0].mxu0 }
 0x109   : > { %v388_v28 = vadd.f32 %v387_v26, %v320_v25  ;;  %v613_v29 = vpop.f32.mrb[1].mxu0 }
 0x10b   : > { %v392_v30 = vsub.f32 %v388_v28, %v391_v27 }
 0x10d   : > { %v394_v31 = vsel %vm393_vm1, %v392_v30, -inf }
 0x10e   : > { %395 = vmax.xlane.f32.xlu0 %v394_v31 }
 0x19b   : > { %v396_v32 = vpop.xlane.xlu0 %395 }
 0x19c   : > { %v397_v33 = vsub.f32 %v392_v30, %v396_v32 }
 0x19e   : > { %v398_v34 = vmul.f32 1.442695, %v397_v33 }
 0x1a0   : > { %665 = vpow2.f32 %v398_v34 }
 0x1aa   : > { %v666_v35 = vpop.eup %665 }
 0x1ab   : > { %v400_v36 = vsel %vm393_vm1, %v666_v35, 0.0 }
 0x1ac   : > { %401 = vadd.xlane.f32.xlu1 %v400_v36 }
 0x239   : > { %v402_v37 = vpop.xlane.xlu1 %401 }
 0x23a   : > { %667 = vrcp.f32 %v402_v37 }
 0x244   : > { %v668_v38 = vpop.eup %667 }
 0x245   : > { %v404_v39 = vmul.f32 %v668_v38, %v666_v35 }
 0x247   : > { %617 = vmatmul.mubr.msk.f32.vlgmr.msra.gmra.mrb[0].mxu1 %vm405_vm2, %v404_v39  ;;  %480 = vst.msk [vmem:[%s277_s29] sm:$0x1] %vm393_vm1, %v404_v39 }
 0x248   : > { %682 = shalt.err (!%p679_p3)
}
 0x249   : > { %s683_s3 = scalar_lea.hbm %s849_s14, 16  ;;  %s687_s22 = scalar_lea.hbm %s895_s6, 32 }
 0x24a   : > { %p684_p4 = scmp.ne.s32.totalorder %s849_s14, %s683_s3  ;;  %p688_p9 = scmp.lt.u32.totalorder %s849_s14, %s895_s6 }
 0x24b   : > { %p689_p10 = scmp.lt.u32.totalorder %s687_s22, %s683_s3  ;;  %p691_p12 = scmp.lt.u32.totalorder %s683_s3, %s849_s14 }
 0x24c   : > { %p685_p7 = pnand %p684_p4, %p813_p5 }
 0x24d   : > { %p690_p11 = por %p689_p10, %p688_p9 }
 0x24e   : > { %p686_p8 = pneg %p685_p7 }
 0x24f   : > { %p692_p13 = por %p691_p12, %p690_p11 }
 0x251   : > { %p693_p0 = pnand %p692_p13, %p686_p8 }
 0x253   : > { %696 = shalt.err (!%p693_p0)
}
 0x254   : > { %620 = dma.vmem_to_hbm [thread:$0]  (%p813_p5), %s501_s11, 16, %s849_s14, %s485_s15  }
 0x255   : > { %s293_s13 = scalar_lea.vmem %s894_s5, %s825_s10 }
 0x31a   : > { %v475_v40 = vpop.f32.mrb[0].mxu1 }
 0x31b   : > { %479 = vst [vmem:[%s293_s13] sm:$0x1] %v475_v40  ;;  %v618_v41 = vpop.f32.mrb[1].mxu1 }
 0x31c PF: > { %p626_p1 = scmp.ge.s32.totalorder %s731_s26, 2  ;;  %s518_s16 = sand.u32 1, %s719_s23  }
 0x31d   : > { %s519_s17 = scalar_lea.sflag [#allocation4], %s518_s16 }
 0x31e   : > { %p623_p2 = pnand %p626_p1, %p817_p6 }
 0x320   : > { %714 = dma.done.wait (!%p623_p2), %s519_s17, 16  }
 0x321   : > { %716 = vsyncadd (!%p623_p2), %s519_s17, 4294967280  ;;  %p19_p5 = scmp.ge.s32.totalorder %s800_s28, 4   ;;  %s898_s23 = smov %s723_s24 }
 0x322   : > { %s899_s24 = smov %s727_s25  ;;  %s900_s25 = smov %s811_s7 }
 0x323   : > { %s901_s26 = smov %s800_s28  ;;  %21 = sbr.rel (!%p19_p5) target bundleno = 6 (0x6), region = 93 }
 0x32a   :  { %523 = vsyncpa [#allocation4], 1 }
 0x32b   :  { %525 = vsyncpa [#allocation4 + $0x1], 1 }

// kernel: explainable_model_forward.15
= control target key start
LH: loop header
LB: loop body
LE: loop exit
PB: predicated region body
PF: predicated region fallthrough
CT: control target
= control target key end

     0   :  { %v392_v1 = vmov 0.0   ;;  %vm393_vm0 = vmmov 0   ;;  %s502_s0 = inlined_call_operand.vmem [shape: f32[2,128], index: 0, kind: input, shape index: {}]   ;;  %s503_s1 = inlined_call_operand.vmem [shape: bf16[2,128], index: 1, kind: input, shape index: {}]   ;;  %s504_s2 = inlined_call_operand.vmem [shape: bf16[128,128], index: 2, kind: input, shape index: {}]   ;;  %s505_s3 = inlined_call_operand.vmem [shape: f32[1,128], index: 3, kind: input, shape index: {}]   ;;  %s506_s4 = inlined_call_operand.vmem [shape: bf16[128,3], index: 4, kind: input, shape index: {}]   ;;  %s507_s5 = inlined_call_operand.vmem [shape: f32[1,3], index: 5, kind: input, shape index: {}]   ;;  %s508_s6 = inlined_call_operand.hbm [shape: f32[2,3], index: 6, kind: output, shape index: {}]  }
   0x1   :  { %v350_v0 = vld [vmem:[%s504_s2] sm:$0xff]   ;;  %307 = vmatprep.subr.bf16.mxu0 %v392_v1  ;;  %327 = vmatprep.subr.bf16.mxu1 %v392_v1  ;;  %v351_v2 = vld [vmem:[%s504_s2 + $0x8] sm:$0xff]   ;;  %v352_v3 = vld [vmem:[%s504_s2 + $0x10] sm:$0xff]  }
   0x2   :  { %308 = vmatpush3.bf16.msra.mxu0 %v350_v0  ;;  %323 = vmatprep.mubr.msk.bf16.mxu0 %vm393_vm0, %v392_v1  ;;  %v26_v4 = vld [vmem:[%s503_s1] sm:$0x1]  ;;  %v353_v7 = vld [vmem:[%s504_s2 + $0x18] sm:$0xff]   ;;  %v359_v8 = vld [vmem:[%s506_s4 + $0x8] sm:$0xff]  }
   0x3   :  { %309 = vmatprep.subr.bf16.mxu0 %v392_v1  ;;  %343 = vmatprep.mubr.msk.bf16.mxu1 %vm393_vm0, %v392_v1  ;;  %v27_v5 = vunpack.c.l.bf16 %v26_v4  ;;  %v358_v6 = vld [vmem:[%s506_s4] sm:$0xff]   ;;  %v360_v10 = vld [vmem:[%s506_s4 + $0x10] sm:$0xff]  }
   0x4   :  { %328 = vmatpush3.bf16.msra.mxu1 %v358_v6  ;;  %v354_v9 = vld [vmem:[%s504_s2 + $0x20] sm:$0xff]  }
   0x5   :  { %366 = vtanh.f32 %v27_v5  ;;  %329 = vmatprep.subr.bf16.mxu1 %v392_v1 }
   0x6   :  { %310 = vmatpush3.bf16.msra.mxu0 %v351_v2 }
   0x7   :  { %311 = vmatprep.subr.bf16.mxu0 %v392_v1 }
   0x8   :  { %330 = vmatpush3.bf16.msra.mxu1 %v359_v8 }
   0x9   :  { %331 = vmatprep.subr.bf16.mxu1 %v392_v1 }
   0xa   :  { %312 = vmatpush3.bf16.msra.mxu0 %v352_v3 }
   0xb   :  { %313 = vmatprep.subr.bf16.mxu0 %v392_v1 }
   0xe   :  { %314 = vmatpush3.bf16.msra.mxu0 %v353_v7 }
   0xf   :  { %315 = vmatprep.subr.bf16.mxu0 %v392_v1 }
  0x10   :  { %11 = vsyncpa [#allocation3], 0  ;;  %v355_v11 = vld [vmem:[%s504_s2 + $0x28] sm:$0xff]   ;;  %332 = vmatpush3.bf16.msra.mxu1 %v360_v10  ;;  %v361_v12 = vld [vmem:[%s506_s4 + $0x18] sm:$0xff]   ;;  %v367_v13 = vpop.eup %366  ;;  %s394_s10 = smov [#allocation2]   ;;  %vm255_vm1 = vcmask 17408  }
  0x11   :  { %333 = vmatprep.subr.bf16.mxu1 %v392_v1  ;;  %v356_v14 = vld [vmem:[%s504_s2 + $0x30] sm:$0xff]   ;;  %v25_v15 = vld [vmem:[%s502_s0] sm:$0x3]  ;;  %v357_v18 = vld [vmem:[%s504_s2 + $0x38] sm:$0xff]   ;;  %s263_s1 = sshll.u32 %s394_s10, 4  ;;  %s264_s1 = int_to_ptr.vmem [resolvable:$true] %s263_s1 }
  0x12   :  { %316 = vmatpush3.bf16.msra.mxu0 %v354_v9  ;;  %v362_v16 = vld [vmem:[%s506_s4 + $0x20] sm:$0xff]   ;;  %v29_v17 = vadd.f32 %v367_v13, %v25_v15  ;;  %v363_v19 = vld [vmem:[%s506_s4 + $0x28] sm:$0xff]   ;;  %v364_v21 = vld [vmem:[%s506_s4 + $0x30] sm:$0xff]   ;;  %p373_p1 = scmp.lt.s32.totalorder %s264_s1, %s264_s1 }
  0x13   :  { %317 = vmatprep.subr.bf16.mxu0 %v392_v1  ;;  %v365_v22 = vld [vmem:[%s506_s4 + $0x38] sm:$0xff]   ;;  %v271_v23 = vld [vmem:[%s505_s3] ss:$0 sm:$0xff]  ;;  %s368_s3 = scalar_lea.vmem %s264_s1, 32 }
  0x14   :  { %334 = vmatpush3.bf16.msra.mxu1 %v361_v12  ;;  %v30_v20 = vpack.c.bf16 %v29_v17, %v29_v17  ;;  %v280_v31 = vld [vmem:[%s507_s5] ss:$0 sm:$0xff]  ;;  %p369_p0 = scmp.ne.s32.totalorder %s264_s1, %s368_s3  ;;  %p374_p2 = scmp.lt.s32.totalorder %s368_s3, %s368_s3 }
  0x15   :  { %335 = vmatprep.subr.bf16.mxu1 %v392_v1 }
  0x16   :  { %318 = vmatpush3.bf16.msra.mxu0 %v355_v11  ;;  %p375_p3 = por %p374_p2, %p373_p1 }
  0x17   :  { %319 = vmatprep.subr.bf16.mxu0 %v392_v1 }
  0x18   :  { %336 = vmatpush3.bf16.msra.mxu1 %v362_v16  ;;  %p376_p4 = pnand %p375_p3, %p369_p0 }
  0x19   :  { %337 = vmatprep.subr.bf16.mxu1 %v392_v1 }
  0x1a   :  { %320 = vmatpush3.bf16.msra.mxu0 %v356_v14 }
  0x1b   :  { %321 = vmatprep.subr.bf16.mxu0 %v392_v1 }
  0x1c   :  { %338 = vmatpush3.bf16.msra.mxu1 %v363_v19 }
  0x1d   :  { %339 = vmatprep.subr.bf16.mxu1 %v392_v1 }
  0x1e   :  { %322 = vmatpush3.bf16.msra.mxu0 %v357_v18 }
  0x20   :  { %340 = vmatpush3.bf16.msra.mxu1 %v364_v21 }
  0x21   :  { %324 = vmatmul.mubr.bf16.vlgmr.msra.gmra.mrb[0].mxu0 %v30_v20  ;;  %341 = vmatprep.subr.bf16.mxu1 %v392_v1 }
  0x24   :  { %342 = vmatpush3.bf16.msra.mxu1 %v365_v22 }
  0xf4   :  { %v136_v24 = vpop.f32.mrb[0].mxu0 }
  0xf5   :  { %v137_v25 = vadd.f32 %v271_v23, %v136_v24  ;;  %v325_v26 = vpop.f32.mrb[1].mxu0 }
  0xf6   :  { %v139_v27 = vpop.f32.mrb[2].mxu0 }
  0xf7   :  { %v142_v28 = vmax.f32 %v137_v25, 0.0  ;;  %v326_v29 = vpop.f32.mrb[3].mxu0 }
  0xf9   :  { %v143_v30 = vpack.c.bf16 %v142_v28, %v142_v28 }
  0xfb   :  { %344 = vmatmul.mubr.bf16.vlgmr.msra.gmra.mrb[0].mxu1 %v143_v30 }
 0x1ce   :  { %v249_v32 = vpop.f32.mrb[0].mxu1 }
 0x1cf   :  { %v250_v33 = vadd.f32 %v280_v31, %v249_v32  ;;  %v345_v34 = vpop.f32.mrb[1].mxu1 }
 0x1d0   :  { %v252_v35 = vpop.f32.mrb[2].mxu1 }
 0x1d1   :  { %v346_v36 = vpop.f32.mrb[3].mxu1  ;;  %256 = vst.msk [vmem:[#allocation2] sm:$0x3] %vm255_vm1, %v250_v33 }
 0x1d2   :  { %379 = shalt.err (!%p376_p4)
}
 0x1d3   :  { %s380_s5 = scalar_lea.hbm %s508_s6, 32 }
 0x1d4   :  { %p381_p5 = scmp.ne.s32.totalorder %s508_s6, %s380_s5  ;;  %p384_p6 = scmp.lt.u32.totalorder %s380_s5, %s508_s6 }
 0x1d6   :  { %p386_p7 = pnand %p384_p6, %p381_p5 }
 0x1d8   :  { %389 = shalt.err (!%p386_p7)
}
 0x1d9   :  { %266 = dma.vmem_to_hbm [thread:$0]  %s264_s1, 32, %s508_s6, [#allocation3]  }
 0x1da   :  { %390 = dma.done.wait [#allocation3], 32  }
 0x1db   :  { %391 = vsyncadd [#allocation3], 4294967264 }
 0x1dc   :  { %270 = vsyncpa [#allocation3], 1 }

</bundles_post_ra>
